<compile_context>
chip_gen: v5e
topology: v5e:2x2
jax: 0.10.0
libtpu: 0.0.40
codegen_flags: <defaults>
</compile_context>

<pallas_src>
import jax
import jax.numpy as jnp
from jax.experimental import pallas as pl
from jax.experimental.pallas import tpu as pltpu


def _gru_chunk_kernel(gi_ref, mask_ref, whh_ref, bhn_ref,
                      out_ref, hid_ref, h_scratch):
    """One grid step == one chunk of TC timesteps of the GRU.

    gi_ref    : (TC, Bp, 3*Hp)  precomputed input projection, biases folded,
                                gates r/z/n at lane offsets 0 / Hp / 2*Hp
    mask_ref  : (TC, Bp, 1)     1.0 while t < length, else 0.0
    whh_ref   : (Hp, 3*Hp)      padded W_hh^T (gates lane-aligned)
    bhn_ref   : (1, Hp)         b_hn (must stay inside the r* term)
    out_ref   : (TC, Bp, Hp)    outputs for this chunk
    hid_ref   : (Bp, Hp)        final hidden state (written on last chunk)
    h_scratch : (Bp, Hp)        hidden state carried across grid steps (VMEM)
    """
    c = pl.program_id(0)
    TC = gi_ref.shape[0]
    Hp = h_scratch.shape[1]

    @pl.when(c == 0)
    def _init():
        h_scratch[...] = jnp.zeros_like(h_scratch)   # hidden=None -> zeros

    whh = whh_ref[...]        # hoisted loads (invariant over the chunk)
    bhn = bhn_ref[...]
    h = h_scratch[...]        # (Bp, Hp)

    # Statically unrolled recurrence over the time chunk.
    for tt in range(TC):
        gi = gi_ref[tt]                                        # (Bp, 3Hp)
        gh = jnp.dot(h, whh, preferred_element_type=jnp.float32)
        r = jax.nn.sigmoid(gi[:, 0:Hp] + gh[:, 0:Hp])
        z = jax.nn.sigmoid(gi[:, Hp:2 * Hp] + gh[:, Hp:2 * Hp])
        n = jnp.tanh(gi[:, 2 * Hp:] + r * (gh[:, 2 * Hp:] + bhn))
        h_new = (1.0 - z) * n + z * h

        # pack/pad semantics: zero outputs and freeze state past each length.
        v = mask_ref[tt]                                       # (Bp, 1)
        out_ref[tt] = v * h_new                                # lane-dense store
        h = v * h_new + (1.0 - v) * h

    h_scratch[...] = h

    @pl.when(c == pl.num_programs(0) - 1)
    def _finalize():
        hid_ref[...] = h_scratch[...]


@jax.jit
def encoder_forward(params, input_seqs, input_lengths):
    """Equivalent of Encoder.forward(input_seqs, input_lengths, hidden=None).

    input_seqs    : (T, B) int32, padded (lengths sorted descending, as with
                    pack_padded_sequence's enforce_sorted=True convention).
    input_lengths : (B,)   int32
    returns (outputs (T, B, H), hidden (1, B, H))
    """
    emb_table = params["embedding"]        # (V, E)
    w_ih = params["w_ih"]                  # (3H, E)  gate order r, z, n
    w_hh = params["w_hh"]                  # (3H, H)
    b_ih = params["b_ih"]                  # (3H,)
    b_hh = params["b_hh"]                  # (3H,)

    T, B = input_seqs.shape
    E = emb_table.shape[1]
    H = w_hh.shape[1]

    # ---- padded geometry -------------------------------------------------
    TC = min(8, T) if T > 0 else 1          # timesteps per grid step
    T_pad = -(-T // TC) * TC
    Bp = -(-B // 8) * 8                     # sublane quantum (f32)
    Hp = -(-H // 128) * 128                 # lane quantum
    G = 3 * Hp

    # ---- glue: pad inputs, build gate-aligned padded weights --------------
    seq_pad = jnp.pad(input_seqs.astype(jnp.int32),
                      ((0, T_pad - T), (0, Bp - B)))            # (T_pad, Bp)
    lens_pad = jnp.pad(input_lengths.astype(jnp.int32), (0, Bp - B))

    # validity mask: 1.0 while t < length (padded batch rows / timesteps -> 0)
    t_idx = jnp.arange(T_pad, dtype=jnp.int32)[:, None]
    mask = (t_idx < lens_pad[None, :]).astype(jnp.float32)[:, :, None]  # (T_pad,Bp,1)

    # W_ih^T padded so each gate lands at a lane-aligned offset g*Hp.
    wih_t = w_ih.T                                              # (E, 3H)
    whh_t = w_hh.T                                              # (H, 3H)
    wih_pad = jnp.zeros((E, G), jnp.float32)
    whh_pad = jnp.zeros((Hp, G), jnp.float32)
    bias_pad = jnp.zeros((G,), jnp.float32)
    # folded biases: r -> b_ir + b_hr, z -> b_iz + b_hz, n -> b_in (b_hn stays in-kernel)
    gate_bias = (b_ih[0:H] + b_hh[0:H],
                 b_ih[H:2 * H] + b_hh[H:2 * H],
                 b_ih[2 * H:3 * H])
    for g in range(3):
        wih_pad = wih_pad.at[:, g * Hp:g * Hp + H].set(wih_t[:, g * H:(g + 1) * H])
        whh_pad = whh_pad.at[0:H, g * Hp:g * Hp + H].set(whh_t[:, g * H:(g + 1) * H])
        bias_pad = bias_pad.at[g * Hp:g * Hp + H].set(gate_bias[g])
    bhn_pad = jnp.zeros((1, Hp), jnp.float32).at[0, 0:H].set(b_hh[2 * H:3 * H])

    # embedding gather + ONE large batched input projection (full MXU util).
    embedded = jnp.take(emb_table, seq_pad, axis=0)             # (T_pad, Bp, E)
    gi_all = (jnp.dot(embedded.reshape(T_pad * Bp, E), wih_pad,
                      precision=jax.lax.Precision.HIGHEST)
              + bias_pad).reshape(T_pad, Bp, G)                 # (T_pad, Bp, 3Hp)

    # ---- recurrent Pallas kernel ------------------------------------------
    outputs_pad, hid_pad = pl.pallas_call(
        _gru_chunk_kernel,
        out_shape=(
            jax.ShapeDtypeStruct((T_pad, Bp, Hp), jnp.float32),
            jax.ShapeDtypeStruct((Bp, Hp), jnp.float32),
        ),
        grid_spec=pltpu.PrefetchScalarGridSpec(
            num_scalar_prefetch=0,
            grid=(T_pad // TC,),
            in_specs=[
                pl.BlockSpec((TC, Bp, G), lambda c: (c, 0, 0)),   # gi chunk
                pl.BlockSpec((TC, Bp, 1), lambda c: (c, 0, 0)),   # validity mask
                pl.BlockSpec((Hp, G), lambda c: (0, 0)),          # W_hh^T (padded)
                pl.BlockSpec((1, Hp), lambda c: (0, 0)),          # b_hn
            ],
            out_specs=[
                pl.BlockSpec((TC, Bp, Hp), lambda c: (c, 0, 0)),  # outputs chunk
                pl.BlockSpec((Bp, Hp), lambda c: (0, 0)),         # final hidden
            ],
            scratch_shapes=[pltpu.VMEM((Bp, Hp), jnp.float32)],
        ),
        compiler_params=pltpu.CompilerParams(
            # time recurrence is strictly sequential
            # TODO(synk): for real batch sizes, add a leading "parallel" batch
            # grid axis to use both TensorCores on v7x / megacore parts.
            dimension_semantics=("arbitrary",),
        ),
    )(gi_all, mask, whh_pad, bhn_pad)

    outputs = outputs_pad[:T, :B, :H]
    hidden = hid_pad[:B, :H][None]                              # (1, B, H)
    return outputs, hidden


def _reference_forward(params, input_seqs, input_lengths):
    """Pure-JAX reference (lax.scan GRU) for a correctness check."""
    emb_table = params["embedding"]
    w_ih, w_hh, b_ih, b_hh = (params["w_ih"], params["w_hh"],
                              params["b_ih"], params["b_hh"])
    H = w_hh.shape[1]
    T, B = input_seqs.shape
    emb = jnp.take(emb_table, input_seqs, axis=0)             # (T, B, E)
    hi = jnp.zeros((B, H), jnp.float32)

    def step(h, inp):
        x, t = inp
        gi = jnp.dot(x, w_ih.T, precision=jax.lax.Precision.HIGHEST) + b_ih
        gh = jnp.dot(h, w_hh.T, precision=jax.lax.Precision.HIGHEST) + b_hh
        i_r, i_z, i_n = gi[:, :H], gi[:, H:2 * H], gi[:, 2 * H:]
        h_r, h_z, h_n = gh[:, :H], gh[:, H:2 * H], gh[:, 2 * H:]
        r = jax.nn.sigmoid(i_r + h_r)
        z = jax.nn.sigmoid(i_z + h_z)
        n = jnp.tanh(i_n + r * h_n)
        h_new = (1.0 - z) * n + z * h
        valid = (t < input_lengths)[:, None]
        h_next = jnp.where(valid, h_new, h)
        out_t = jnp.where(valid, h_new, 0.0)
        return h_next, out_t

    h_final, outs = jax.lax.scan(step, hi, (emb, jnp.arange(T)))
    return outs, h_final[None]


if __name__ == "__main__":
    # Small, module-consistent sizes.
    vocab_size, embedding_size, output_size = 20, 32, 32
    T, B = 8, 2

    # Deterministic parameter init (shapes match nn.Embedding + nn.GRU).
    kp = jax.random.PRNGKey(42)
    k_emb, k_wih, k_whh, k_bih, k_bhh = jax.random.split(kp, 5)
    bound = 1.0 / jnp.sqrt(jnp.float32(output_size))
    params = {
        "embedding": jax.random.normal(k_emb, (vocab_size, embedding_size), jnp.float32),
        "w_ih": jax.random.uniform(k_wih, (3 * output_size, embedding_size),
                                   jnp.float32, -bound, bound),
        "w_hh": jax.random.uniform(k_whh, (3 * output_size, output_size),
                                   jnp.float32, -bound, bound),
        "b_ih": jax.random.uniform(k_bih, (3 * output_size,), jnp.float32, -bound, bound),
        "b_hh": jax.random.uniform(k_bhh, (3 * output_size,), jnp.float32, -bound, bound),
    }

    # Deterministic example inputs (lengths sorted descending, enforce_sorted=True style).
    ki = jax.random.PRNGKey(0)
    input_seqs = jax.random.randint(ki, (T, B), 0, vocab_size, dtype=jnp.int32)
    input_lengths = jnp.array([T, 5], dtype=jnp.int32)
    # zero out padding tokens (cosmetic; masked anyway)
    pad_mask = (jnp.arange(T)[:, None] < input_lengths[None, :])
    input_seqs = jnp.where(pad_mask, input_seqs, 0)

    outputs, hidden = encoder_forward(params, input_seqs, input_lengths)
    jax.block_until_ready((outputs, hidden))

    ref_out, ref_hid = _reference_forward(params, input_seqs, input_lengths)
    assert outputs.shape == (T, B, output_size)
    assert hidden.shape == (1, B, output_size)
    assert jnp.allclose(outputs, ref_out, rtol=1e-3, atol=1e-3)
    assert jnp.allclose(hidden, ref_hid, rtol=1e-3, atol=1e-3)

    print("KERNEL_OK")
</pallas_src>

<mosaic_0001>
module attributes {stable_mosaic.version = 11 : i64} {
  func.func @_gru_chunk_kernel(%arg0: i32, %arg1: memref<8x8x384xf32, #tpu.memory_space<vmem>>, %arg2: memref<8x8x1xf32, #tpu.memory_space<vmem>>, %arg3: memref<128x384xf32, #tpu.memory_space<vmem>>, %arg4: memref<1x128xf32, #tpu.memory_space<vmem>>, %arg5: memref<8x8x128xf32, #tpu.memory_space<vmem>>, %arg6: memref<8x128xf32, #tpu.memory_space<vmem>>, %arg7: memref<8x128xf32, #tpu.memory_space<vmem>>) attributes {dimension_semantics = [#tpu.dimension_semantics<arbitrary>], iteration_bounds = array<i64: 1>, scalar_prefetch = 0 : i64, scratch_operands = 1 : i64, tpu.core_type = #tpu.core_type<tc>, window_params = [{transform_indices = @transform_0, window_bounds = array<i64: 8, 8, 384>}, {transform_indices = @transform_1, window_bounds = array<i64: 8, 8, 1>}, {pipeline_mode = #tpu.pipeline_mode<synchronous>, transform_indices = @transform_2, window_bounds = array<i64: 128, 384>}, {pipeline_mode = #tpu.pipeline_mode<synchronous>, transform_indices = @transform_3, window_bounds = array<i64: 1, 128>}, {transform_indices = @transform_4, window_bounds = array<i64: 8, 8, 128>}, {pipeline_mode = #tpu.pipeline_mode<synchronous>, transform_indices = @transform_5, window_bounds = array<i64: 8, 128>}]} {
    %c0_i32 = arith.constant 0 : i32
    %0 = arith.cmpi eq, %arg0, %c0_i32 : i32
    %1 = arith.extui %0 : i1 to i32
    %c0_i32_0 = arith.constant 0 : i32
    %2 = arith.cmpi ne, %1, %c0_i32_0 : i32
    scf.if %2 {
      %cst_114 = arith.constant 0.000000e+00 : f32
      %370 = vector.broadcast %cst_114 : f32 to vector<8x128xf32>
      %c0_115 = arith.constant 0 : index
      %c0_116 = arith.constant 0 : index
      %371 = vector.load %arg7[%c0_115, %c0_116] : memref<8x128xf32, #tpu.memory_space<vmem>>, vector<8x128xf32>
      tpu.vector_store %arg7[%c0_115, %c0_116], %370 {strides = array<i32>} : memref<8x128xf32, #tpu.memory_space<vmem>>, vector<8x128xf32>,
    } else {
    }
    %c0 = arith.constant 0 : index
    %c0_1 = arith.constant 0 : index
    %3 = vector.load %arg3[%c0, %c0_1] : memref<128x384xf32, #tpu.memory_space<vmem>>, vector<128x384xf32>
    %c0_2 = arith.constant 0 : index
    %c0_3 = arith.constant 0 : index
    %4 = vector.load %arg4[%c0_2, %c0_3] : memref<1x128xf32, #tpu.memory_space<vmem>>, vector<1x128xf32>
    %c0_4 = arith.constant 0 : index
    %c0_5 = arith.constant 0 : index
    %5 = vector.load %arg7[%c0_4, %c0_5] : memref<8x128xf32, #tpu.memory_space<vmem>>, vector<8x128xf32>
    %c0_6 = arith.constant 0 : index
    %c0_7 = arith.constant 0 : index
    %c0_8 = arith.constant 0 : index
    %6 = vector.load %arg1[%c0_6, %c0_7, %c0_8] : memref<8x8x384xf32, #tpu.memory_space<vmem>>, vector<1x8x384xf32>
    %7 = vector.shape_cast %6 : vector<1x8x384xf32> to vector<8x384xf32>
    %cst = arith.constant dense<0.000000e+00> : vector<8x384xf32>
    %8 = tpu.matmul %5, %3, %cst {dimension_numbers = #tpu.dot_dimension_numbers<[1], [0], [0], [1], [0, 0, 1, 1], [], []>} : vector<8x128xf32>, vector<128x384xf32>, vector<8x384xf32> -> vector<8x384xf32>
    %9 = vector.extract_strided_slice %7 {offsets = [0, 0], sizes = [8, 128], strides = [1, 1]} : vector<8x384xf32> to vector<8x128xf32>
    %10 = vector.extract_strided_slice %8 {offsets = [0, 0], sizes = [8, 128], strides = [1, 1]} : vector<8x384xf32> to vector<8x128xf32>
    %11 = arith.addf %9, %10 : vector<8x128xf32>
    %12 = arith.negf %11 : vector<8x128xf32>
    %13 = math.exp %12 : vector<8x128xf32>
    %cst_9 = arith.constant 1.000000e+00 : f32
    %14 = vector.broadcast %cst_9 : f32 to vector<8x128xf32>
    %15 = arith.addf %14, %13 : vector<8x128xf32>
    %16 = arith.divf %14, %15 : vector<8x128xf32>
    %17 = vector.extract_strided_slice %7 {offsets = [0, 128], sizes = [8, 128], strides = [1, 1]} : vector<8x384xf32> to vector<8x128xf32>
    %18 = vector.extract_strided_slice %8 {offsets = [0, 128], sizes = [8, 128], strides = [1, 1]} : vector<8x384xf32> to vector<8x128xf32>
    %19 = arith.addf %17, %18 : vector<8x128xf32>
    %20 = arith.negf %19 : vector<8x128xf32>
    %21 = math.exp %20 : vector<8x128xf32>
    %cst_10 = arith.constant 1.000000e+00 : f32
    %22 = vector.broadcast %cst_10 : f32 to vector<8x128xf32>
    %23 = arith.addf %22, %21 : vector<8x128xf32>
    %24 = arith.divf %22, %23 : vector<8x128xf32>
    %25 = vector.extract_strided_slice %7 {offsets = [0, 256], sizes = [8, 128], strides = [1, 1]} : vector<8x384xf32> to vector<8x128xf32>
    %26 = vector.extract_strided_slice %8 {offsets = [0, 256], sizes = [8, 128], strides = [1, 1]} : vector<8x384xf32> to vector<8x128xf32>
    %27 = vector.broadcast %4 : vector<1x128xf32> to vector<8x128xf32>
    %28 = arith.addf %26, %27 : vector<8x128xf32>
    %29 = arith.mulf %16, %28 : vector<8x128xf32>
    %30 = arith.addf %25, %29 : vector<8x128xf32>
    %31 = math.tanh %30 : vector<8x128xf32>
    %cst_11 = arith.constant 1.000000e+00 : f32
    %32 = vector.broadcast %cst_11 : f32 to vector<8x128xf32>
    %33 = arith.subf %32, %24 : vector<8x128xf32>
    %34 = arith.mulf %33, %31 : vector<8x128xf32>
    %35 = arith.mulf %24, %5 : vector<8x128xf32>
    %36 = arith.addf %34, %35 : vector<8x128xf32>
    %c0_12 = arith.constant 0 : index
    %c0_13 = arith.constant 0 : index
    %c0_14 = arith.constant 0 : index
    %37 = vector.load %arg2[%c0_12, %c0_13, %c0_14] : memref<8x8x1xf32, #tpu.memory_space<vmem>>, vector<1x8x1xf32>
    %38 = vector.shape_cast %37 : vector<1x8x1xf32> to vector<8x1xf32>
    %39 = vector.broadcast %38 : vector<8x1xf32> to vector<8x128xf32>
    %40 = arith.mulf %39, %36 : vector<8x128xf32>
    %c0_15 = arith.constant 0 : index
    %c0_16 = arith.constant 0 : index
    %c0_17 = arith.constant 0 : index
    %41 = vector.load %arg5[%c0_15, %c0_16, %c0_17] : memref<8x8x128xf32, #tpu.memory_space<vmem>>, vector<1x8x128xf32>
    %42 = vector.shape_cast %41 : vector<1x8x128xf32> to vector<8x128xf32>
    %43 = vector.shape_cast %40 : vector<8x128xf32> to vector<1x8x128xf32>
    tpu.vector_store %arg5[%c0_15, %c0_16, %c0_17], %43 {strides = array<i32>} : memref<8x8x128xf32, #tpu.memory_space<vmem>>, vector<1x8x128xf32>,
    %44 = vector.broadcast %38 : vector<8x1xf32> to vector<8x128xf32>
    %45 = arith.mulf %44, %36 : vector<8x128xf32>
    %cst_18 = arith.constant 1.000000e+00 : f32
    %46 = vector.broadcast %cst_18 : f32 to vector<8x1xf32>
    %47 = arith.subf %46, %38 : vector<8x1xf32>
    %48 = vector.broadcast %47 : vector<8x1xf32> to vector<8x128xf32>
    %49 = arith.mulf %48, %5 : vector<8x128xf32>
    %50 = arith.addf %45, %49 : vector<8x128xf32>
    %c1 = arith.constant 1 : index
    %c0_19 = arith.constant 0 : index
    %c0_20 = arith.constant 0 : index
    %51 = vector.load %arg1[%c1, %c0_19, %c0_20] : memref<8x8x384xf32, #tpu.memory_space<vmem>>, vector<1x8x384xf32>
    %52 = vector.shape_cast %51 : vector<1x8x384xf32> to vector<8x384xf32>
    %cst_21 = arith.constant dense<0.000000e+00> : vector<8x384xf32>
    %53 = tpu.matmul %50, %3, %cst_21 {dimension_numbers = #tpu.dot_dimension_numbers<[1], [0], [0], [1], [0, 0, 1, 1], [], []>} : vector<8x128xf32>, vector<128x384xf32>, vector<8x384xf32> -> vector<8x384xf32>
    %54 = vector.extract_strided_slice %52 {offsets = [0, 0], sizes = [8, 128], strides = [1, 1]} : vector<8x384xf32> to vector<8x128xf32>
    %55 = vector.extract_strided_slice %53 {offsets = [0, 0], sizes = [8, 128], strides = [1, 1]} : vector<8x384xf32> to vector<8x128xf32>
    %56 = arith.addf %54, %55 : vector<8x128xf32>
    %57 = arith.negf %56 : vector<8x128xf32>
    %58 = math.exp %57 : vector<8x128xf32>
    %cst_22 = arith.constant 1.000000e+00 : f32
    %59 = vector.broadcast %cst_22 : f32 to vector<8x128xf32>
    %60 = arith.addf %59, %58 : vector<8x128xf32>
    %61 = arith.divf %59, %60 : vector<8x128xf32>
    %62 = vector.extract_strided_slice %52 {offsets = [0, 128], sizes = [8, 128], strides = [1, 1]} : vector<8x384xf32> to vector<8x128xf32>
    %63 = vector.extract_strided_slice %53 {offsets = [0, 128], sizes = [8, 128], strides = [1, 1]} : vector<8x384xf32> to vector<8x128xf32>
    %64 = arith.addf %62, %63 : vector<8x128xf32>
    %65 = arith.negf %64 : vector<8x128xf32>
    %66 = math.exp %65 : vector<8x128xf32>
    %cst_23 = arith.constant 1.000000e+00 : f32
    %67 = vector.broadcast %cst_23 : f32 to vector<8x128xf32>
    %68 = arith.addf %67, %66 : vector<8x128xf32>
    %69 = arith.divf %67, %68 : vector<8x128xf32>
    %70 = vector.extract_strided_slice %52 {offsets = [0, 256], sizes = [8, 128], strides = [1, 1]} : vector<8x384xf32> to vector<8x128xf32>
    %71 = vector.extract_strided_slice %53 {offsets = [0, 256], sizes = [8, 128], strides = [1, 1]} : vector<8x384xf32> to vector<8x128xf32>
    %72 = vector.broadcast %4 : vector<1x128xf32> to vector<8x128xf32>
    %73 = arith.addf %71, %72 : vector<8x128xf32>
    %74 = arith.mulf %61, %73 : vector<8x128xf32>
    %75 = arith.addf %70, %74 : vector<8x128xf32>
    %76 = math.tanh %75 : vector<8x128xf32>
    %cst_24 = arith.constant 1.000000e+00 : f32
    %77 = vector.broadcast %cst_24 : f32 to vector<8x128xf32>
    %78 = arith.subf %77, %69 : vector<8x128xf32>
    %79 = arith.mulf %78, %76 : vector<8x128xf32>
    %80 = arith.mulf %69, %50 : vector<8x128xf32>
    %81 = arith.addf %79, %80 : vector<8x128xf32>
    %c1_25 = arith.constant 1 : index
    %c0_26 = arith.constant 0 : index
    %c0_27 = arith.constant 0 : index
    %82 = vector.load %arg2[%c1_25, %c0_26, %c0_27] : memref<8x8x1xf32, #tpu.memory_space<vmem>>, vector<1x8x1xf32>
    %83 = vector.shape_cast %82 : vector<1x8x1xf32> to vector<8x1xf32>
    %84 = vector.broadcast %83 : vector<8x1xf32> to vector<8x128xf32>
    %85 = arith.mulf %84, %81 : vector<8x128xf32>
    %c1_28 = arith.constant 1 : index
    %c0_29 = arith.constant 0 : index
    %c0_30 = arith.constant 0 : index
    %86 = vector.load %arg5[%c1_28, %c0_29, %c0_30] : memref<8x8x128xf32, #tpu.memory_space<vmem>>, vector<1x8x128xf32>
    %87 = vector.shape_cast %86 : vector<1x8x128xf32> to vector<8x128xf32>
    %88 = vector.shape_cast %85 : vector<8x128xf32> to vector<1x8x128xf32>
    tpu.vector_store %arg5[%c1_28, %c0_29, %c0_30], %88 {strides = array<i32>} : memref<8x8x128xf32, #tpu.memory_space<vmem>>, vector<1x8x128xf32>,
    %89 = vector.broadcast %83 : vector<8x1xf32> to vector<8x128xf32>
    %90 = arith.mulf %89, %81 : vector<8x128xf32>
    %cst_31 = arith.constant 1.000000e+00 : f32
    %91 = vector.broadcast %cst_31 : f32 to vector<8x1xf32>
    %92 = arith.subf %91, %83 : vector<8x1xf32>
    %93 = vector.broadcast %92 : vector<8x1xf32> to vector<8x128xf32>
    %94 = arith.mulf %93, %50 : vector<8x128xf32>
    %95 = arith.addf %90, %94 : vector<8x128xf32>
    %c2 = arith.constant 2 : index
    %c0_32 = arith.constant 0 : index
    %c0_33 = arith.constant 0 : index
    %96 = vector.load %arg1[%c2, %c0_32, %c0_33] : memref<8x8x384xf32, #tpu.memory_space<vmem>>, vector<1x8x384xf32>
    %97 = vector.shape_cast %96 : vector<1x8x384xf32> to vector<8x384xf32>
    %cst_34 = arith.constant dense<0.000000e+00> : vector<8x384xf32>
    %98 = tpu.matmul %95, %3, %cst_34 {dimension_numbers = #tpu.dot_dimension_numbers<[1], [0], [0], [1], [0, 0, 1, 1], [], []>} : vector<8x128xf32>, vector<128x384xf32>, vector<8x384xf32> -> vector<8x384xf32>
    %99 = vector.extract_strided_slice %97 {offsets = [0, 0], sizes = [8, 128], strides = [1, 1]} : vector<8x384xf32> to vector<8x128xf32>
    %100 = vector.extract_strided_slice %98 {offsets = [0, 0], sizes = [8, 128], strides = [1, 1]} : vector<8x384xf32> to vector<8x128xf32>
    %101 = arith.addf %99, %100 : vector<8x128xf32>
    %102 = arith.negf %101 : vector<8x128xf32>
    %103 = math.exp %102 : vector<8x128xf32>
    %cst_35 = arith.constant 1.000000e+00 : f32
    %104 = vector.broadcast %cst_35 : f32 to vector<8x128xf32>
    %105 = arith.addf %104, %103 : vector<8x128xf32>
    %106 = arith.divf %104, %105 : vector<8x128xf32>
    %107 = vector.extract_strided_slice %97 {offsets = [0, 128], sizes = [8, 128], strides = [1, 1]} : vector<8x384xf32> to vector<8x128xf32>
    %108 = vector.extract_strided_slice %98 {offsets = [0, 128], sizes = [8, 128], strides = [1, 1]} : vector<8x384xf32> to vector<8x128xf32>
    %109 = arith.addf %107, %108 : vector<8x128xf32>
    %110 = arith.negf %109 : vector<8x128xf32>
    %111 = math.exp %110 : vector<8x128xf32>
    %cst_36 = arith.constant 1.000000e+00 : f32
    %112 = vector.broadcast %cst_36 : f32 to vector<8x128xf32>
    %113 = arith.addf %112, %111 : vector<8x128xf32>
    %114 = arith.divf %112, %113 : vector<8x128xf32>
    %115 = vector.extract_strided_slice %97 {offsets = [0, 256], sizes = [8, 128], strides = [1, 1]} : vector<8x384xf32> to vector<8x128xf32>
    %116 = vector.extract_strided_slice %98 {offsets = [0, 256], sizes = [8, 128], strides = [1, 1]} : vector<8x384xf32> to vector<8x128xf32>
    %117 = vector.broadcast %4 : vector<1x128xf32> to vector<8x128xf32>
    %118 = arith.addf %116, %117 : vector<8x128xf32>
    %119 = arith.mulf %106, %118 : vector<8x128xf32>
    %120 = arith.addf %115, %119 : vector<8x128xf32>
    %121 = math.tanh %120 : vector<8x128xf32>
    %cst_37 = arith.constant 1.000000e+00 : f32
    %122 = vector.broadcast %cst_37 : f32 to vector<8x128xf32>
    %123 = arith.subf %122, %114 : vector<8x128xf32>
    %124 = arith.mulf %123, %121 : vector<8x128xf32>
    %125 = arith.mulf %114, %95 : vector<8x128xf32>
    %126 = arith.addf %124, %125 : vector<8x128xf32>
    %c2_38 = arith.constant 2 : index
    %c0_39 = arith.constant 0 : index
    %c0_40 = arith.constant 0 : index
    %127 = vector.load %arg2[%c2_38, %c0_39, %c0_40] : memref<8x8x1xf32, #tpu.memory_space<vmem>>, vector<1x8x1xf32>
    %128 = vector.shape_cast %127 : vector<1x8x1xf32> to vector<8x1xf32>
    %129 = vector.broadcast %128 : vector<8x1xf32> to vector<8x128xf32>
    %130 = arith.mulf %129, %126 : vector<8x128xf32>
    %c2_41 = arith.constant 2 : index
    %c0_42 = arith.constant 0 : index
    %c0_43 = arith.constant 0 : index
    %131 = vector.load %arg5[%c2_41, %c0_42, %c0_43] : memref<8x8x128xf32, #tpu.memory_space<vmem>>, vector<1x8x128xf32>
    %132 = vector.shape_cast %131 : vector<1x8x128xf32> to vector<8x128xf32>
    %133 = vector.shape_cast %130 : vector<8x128xf32> to vector<1x8x128xf32>
    tpu.vector_store %arg5[%c2_41, %c0_42, %c0_43], %133 {strides = array<i32>} : memref<8x8x128xf32, #tpu.memory_space<vmem>>, vector<1x8x128xf32>,
    %134 = vector.broadcast %128 : vector<8x1xf32> to vector<8x128xf32>
    %135 = arith.mulf %134, %126 : vector<8x128xf32>
    %cst_44 = arith.constant 1.000000e+00 : f32
    %136 = vector.broadcast %cst_44 : f32 to vector<8x1xf32>
    %137 = arith.subf %136, %128 : vector<8x1xf32>
    %138 = vector.broadcast %137 : vector<8x1xf32> to vector<8x128xf32>
    %139 = arith.mulf %138, %95 : vector<8x128xf32>
    %140 = arith.addf %135, %139 : vector<8x128xf32>
    %c3 = arith.constant 3 : index
    %c0_45 = arith.constant 0 : index
    %c0_46 = arith.constant 0 : index
    %141 = vector.load %arg1[%c3, %c0_45, %c0_46] : memref<8x8x384xf32, #tpu.memory_space<vmem>>, vector<1x8x384xf32>
    %142 = vector.shape_cast %141 : vector<1x8x384xf32> to vector<8x384xf32>
    %cst_47 = arith.constant dense<0.000000e+00> : vector<8x384xf32>
    %143 = tpu.matmul %140, %3, %cst_47 {dimension_numbers = #tpu.dot_dimension_numbers<[1], [0], [0], [1], [0, 0, 1, 1], [], []>} : vector<8x128xf32>, vector<128x384xf32>, vector<8x384xf32> -> vector<8x384xf32>
    %144 = vector.extract_strided_slice %142 {offsets = [0, 0], sizes = [8, 128], strides = [1, 1]} : vector<8x384xf32> to vector<8x128xf32>
    %145 = vector.extract_strided_slice %143 {offsets = [0, 0], sizes = [8, 128], strides = [1, 1]} : vector<8x384xf32> to vector<8x128xf32>
    %146 = arith.addf %144, %145 : vector<8x128xf32>
    %147 = arith.negf %146 : vector<8x128xf32>
    %148 = math.exp %147 : vector<8x128xf32>
    %cst_48 = arith.constant 1.000000e+00 : f32
    %149 = vector.broadcast %cst_48 : f32 to vector<8x128xf32>
    %150 = arith.addf %149, %148 : vector<8x128xf32>
    %151 = arith.divf %149, %150 : vector<8x128xf32>
    %152 = vector.extract_strided_slice %142 {offsets = [0, 128], sizes = [8, 128], strides = [1, 1]} : vector<8x384xf32> to vector<8x128xf32>
    %153 = vector.extract_strided_slice %143 {offsets = [0, 128], sizes = [8, 128], strides = [1, 1]} : vector<8x384xf32> to vector<8x128xf32>
    %154 = arith.addf %152, %153 : vector<8x128xf32>
    %155 = arith.negf %154 : vector<8x128xf32>
    %156 = math.exp %155 : vector<8x128xf32>
    %cst_49 = arith.constant 1.000000e+00 : f32
    %157 = vector.broadcast %cst_49 : f32 to vector<8x128xf32>
    %158 = arith.addf %157, %156 : vector<8x128xf32>
    %159 = arith.divf %157, %158 : vector<8x128xf32>
    %160 = vector.extract_strided_slice %142 {offsets = [0, 256], sizes = [8, 128], strides = [1, 1]} : vector<8x384xf32> to vector<8x128xf32>
    %161 = vector.extract_strided_slice %143 {offsets = [0, 256], sizes = [8, 128], strides = [1, 1]} : vector<8x384xf32> to vector<8x128xf32>
    %162 = vector.broadcast %4 : vector<1x128xf32> to vector<8x128xf32>
    %163 = arith.addf %161, %162 : vector<8x128xf32>
    %164 = arith.mulf %151, %163 : vector<8x128xf32>
    %165 = arith.addf %160, %164 : vector<8x128xf32>
    %166 = math.tanh %165 : vector<8x128xf32>
    %cst_50 = arith.constant 1.000000e+00 : f32
    %167 = vector.broadcast %cst_50 : f32 to vector<8x128xf32>
    %168 = arith.subf %167, %159 : vector<8x128xf32>
    %169 = arith.mulf %168, %166 : vector<8x128xf32>
    %170 = arith.mulf %159, %140 : vector<8x128xf32>
    %171 = arith.addf %169, %170 : vector<8x128xf32>
    %c3_51 = arith.constant 3 : index
    %c0_52 = arith.constant 0 : index
    %c0_53 = arith.constant 0 : index
    %172 = vector.load %arg2[%c3_51, %c0_52, %c0_53] : memref<8x8x1xf32, #tpu.memory_space<vmem>>, vector<1x8x1xf32>
    %173 = vector.shape_cast %172 : vector<1x8x1xf32> to vector<8x1xf32>
    %174 = vector.broadcast %173 : vector<8x1xf32> to vector<8x128xf32>
    %175 = arith.mulf %174, %171 : vector<8x128xf32>
    %c3_54 = arith.constant 3 : index
    %c0_55 = arith.constant 0 : index
    %c0_56 = arith.constant 0 : index
    %176 = vector.load %arg5[%c3_54, %c0_55, %c0_56] : memref<8x8x128xf32, #tpu.memory_space<vmem>>, vector<1x8x128xf32>
    %177 = vector.shape_cast %176 : vector<1x8x128xf32> to vector<8x128xf32>
    %178 = vector.shape_cast %175 : vector<8x128xf32> to vector<1x8x128xf32>
    tpu.vector_store %arg5[%c3_54, %c0_55, %c0_56], %178 {strides = array<i32>} : memref<8x8x128xf32, #tpu.memory_space<vmem>>, vector<1x8x128xf32>,
    %179 = vector.broadcast %173 : vector<8x1xf32> to vector<8x128xf32>
    %180 = arith.mulf %179, %171 : vector<8x128xf32>
    %cst_57 = arith.constant 1.000000e+00 : f32
    %181 = vector.broadcast %cst_57 : f32 to vector<8x1xf32>
    %182 = arith.subf %181, %173 : vector<8x1xf32>
    %183 = vector.broadcast %182 : vector<8x1xf32> to vector<8x128xf32>
    %184 = arith.mulf %183, %140 : vector<8x128xf32>
    %185 = arith.addf %180, %184 : vector<8x128xf32>
    %c4 = arith.constant 4 : index
    %c0_58 = arith.constant 0 : index
    %c0_59 = arith.constant 0 : index
    %186 = vector.load %arg1[%c4, %c0_58, %c0_59] : memref<8x8x384xf32, #tpu.memory_space<vmem>>, vector<1x8x384xf32>
    %187 = vector.shape_cast %186 : vector<1x8x384xf32> to vector<8x384xf32>
    %cst_60 = arith.constant dense<0.000000e+00> : vector<8x384xf32>
    %188 = tpu.matmul %185, %3, %cst_60 {dimension_numbers = #tpu.dot_dimension_numbers<[1], [0], [0], [1], [0, 0, 1, 1], [], []>} : vector<8x128xf32>, vector<128x384xf32>, vector<8x384xf32> -> vector<8x384xf32>
    %189 = vector.extract_strided_slice %187 {offsets = [0, 0], sizes = [8, 128], strides = [1, 1]} : vector<8x384xf32> to vector<8x128xf32>
    %190 = vector.extract_strided_slice %188 {offsets = [0, 0], sizes = [8, 128], strides = [1, 1]} : vector<8x384xf32> to vector<8x128xf32>
    %191 = arith.addf %189, %190 : vector<8x128xf32>
    %192 = arith.negf %191 : vector<8x128xf32>
    %193 = math.exp %192 : vector<8x128xf32>
    %cst_61 = arith.constant 1.000000e+00 : f32
    %194 = vector.broadcast %cst_61 : f32 to vector<8x128xf32>
    %195 = arith.addf %194, %193 : vector<8x128xf32>
    %196 = arith.divf %194, %195 : vector<8x128xf32>
    %197 = vector.extract_strided_slice %187 {offsets = [0, 128], sizes = [8, 128], strides = [1, 1]} : vector<8x384xf32> to vector<8x128xf32>
    %198 = vector.extract_strided_slice %188 {offsets = [0, 128], sizes = [8, 128], strides = [1, 1]} : vector<8x384xf32> to vector<8x128xf32>
    %199 = arith.addf %197, %198 : vector<8x128xf32>
    %200 = arith.negf %199 : vector<8x128xf32>
    %201 = math.exp %200 : vector<8x128xf32>
    %cst_62 = arith.constant 1.000000e+00 : f32
    %202 = vector.broadcast %cst_62 : f32 to vector<8x128xf32>
    %203 = arith.addf %202, %201 : vector<8x128xf32>
    %204 = arith.divf %202, %203 : vector<8x128xf32>
    %205 = vector.extract_strided_slice %187 {offsets = [0, 256], sizes = [8, 128], strides = [1, 1]} : vector<8x384xf32> to vector<8x128xf32>
    %206 = vector.extract_strided_slice %188 {offsets = [0, 256], sizes = [8, 128], strides = [1, 1]} : vector<8x384xf32> to vector<8x128xf32>
    %207 = vector.broadcast %4 : vector<1x128xf32> to vector<8x128xf32>
    %208 = arith.addf %206, %207 : vector<8x128xf32>
    %209 = arith.mulf %196, %208 : vector<8x128xf32>
    %210 = arith.addf %205, %209 : vector<8x128xf32>
    %211 = math.tanh %210 : vector<8x128xf32>
    %cst_63 = arith.constant 1.000000e+00 : f32
    %212 = vector.broadcast %cst_63 : f32 to vector<8x128xf32>
    %213 = arith.subf %212, %204 : vector<8x128xf32>
    %214 = arith.mulf %213, %211 : vector<8x128xf32>
    %215 = arith.mulf %204, %185 : vector<8x128xf32>
    %216 = arith.addf %214, %215 : vector<8x128xf32>
    %c4_64 = arith.constant 4 : index
    %c0_65 = arith.constant 0 : index
    %c0_66 = arith.constant 0 : index
    %217 = vector.load %arg2[%c4_64, %c0_65, %c0_66] : memref<8x8x1xf32, #tpu.memory_space<vmem>>, vector<1x8x1xf32>
    %218 = vector.shape_cast %217 : vector<1x8x1xf32> to vector<8x1xf32>
    %219 = vector.broadcast %218 : vector<8x1xf32> to vector<8x128xf32>
    %220 = arith.mulf %219, %216 : vector<8x128xf32>
    %c4_67 = arith.constant 4 : index
    %c0_68 = arith.constant 0 : index
    %c0_69 = arith.constant 0 : index
    %221 = vector.load %arg5[%c4_67, %c0_68, %c0_69] : memref<8x8x128xf32, #tpu.memory_space<vmem>>, vector<1x8x128xf32>
    %222 = vector.shape_cast %221 : vector<1x8x128xf32> to vector<8x128xf32>
    %223 = vector.shape_cast %220 : vector<8x128xf32> to vector<1x8x128xf32>
    tpu.vector_store %arg5[%c4_67, %c0_68, %c0_69], %223 {strides = array<i32>} : memref<8x8x128xf32, #tpu.memory_space<vmem>>, vector<1x8x128xf32>,
    %224 = vector.broadcast %218 : vector<8x1xf32> to vector<8x128xf32>
    %225 = arith.mulf %224, %216 : vector<8x128xf32>
    %cst_70 = arith.constant 1.000000e+00 : f32
    %226 = vector.broadcast %cst_70 : f32 to vector<8x1xf32>
    %227 = arith.subf %226, %218 : vector<8x1xf32>
    %228 = vector.broadcast %227 : vector<8x1xf32> to vector<8x128xf32>
    %229 = arith.mulf %228, %185 : vector<8x128xf32>
    %230 = arith.addf %225, %229 : vector<8x128xf32>
    %c5 = arith.constant 5 : index
    %c0_71 = arith.constant 0 : index
    %c0_72 = arith.constant 0 : index
    %231 = vector.load %arg1[%c5, %c0_71, %c0_72] : memref<8x8x384xf32, #tpu.memory_space<vmem>>, vector<1x8x384xf32>
    %232 = vector.shape_cast %231 : vector<1x8x384xf32> to vector<8x384xf32>
    %cst_73 = arith.constant dense<0.000000e+00> : vector<8x384xf32>
    %233 = tpu.matmul %230, %3, %cst_73 {dimension_numbers = #tpu.dot_dimension_numbers<[1], [0], [0], [1], [0, 0, 1, 1], [], []>} : vector<8x128xf32>, vector<128x384xf32>, vector<8x384xf32> -> vector<8x384xf32>
    %234 = vector.extract_strided_slice %232 {offsets = [0, 0], sizes = [8, 128], strides = [1, 1]} : vector<8x384xf32> to vector<8x128xf32>
    %235 = vector.extract_strided_slice %233 {offsets = [0, 0], sizes = [8, 128], strides = [1, 1]} : vector<8x384xf32> to vector<8x128xf32>
    %236 = arith.addf %234, %235 : vector<8x128xf32>
    %237 = arith.negf %236 : vector<8x128xf32>
    %238 = math.exp %237 : vector<8x128xf32>
    %cst_74 = arith.constant 1.000000e+00 : f32
    %239 = vector.broadcast %cst_74 : f32 to vector<8x128xf32>
    %240 = arith.addf %239, %238 : vector<8x128xf32>
    %241 = arith.divf %239, %240 : vector<8x128xf32>
    %242 = vector.extract_strided_slice %232 {offsets = [0, 128], sizes = [8, 128], strides = [1, 1]} : vector<8x384xf32> to vector<8x128xf32>
    %243 = vector.extract_strided_slice %233 {offsets = [0, 128], sizes = [8, 128], strides = [1, 1]} : vector<8x384xf32> to vector<8x128xf32>
    %244 = arith.addf %242, %243 : vector<8x128xf32>
    %245 = arith.negf %244 : vector<8x128xf32>
    %246 = math.exp %245 : vector<8x128xf32>
    %cst_75 = arith.constant 1.000000e+00 : f32
    %247 = vector.broadcast %cst_75 : f32 to vector<8x128xf32>
    %248 = arith.addf %247, %246 : vector<8x128xf32>
    %249 = arith.divf %247, %248 : vector<8x128xf32>
    %250 = vector.extract_strided_slice %232 {offsets = [0, 256], sizes = [8, 128], strides = [1, 1]} : vector<8x384xf32> to vector<8x128xf32>
    %251 = vector.extract_strided_slice %233 {offsets = [0, 256], sizes = [8, 128], strides = [1, 1]} : vector<8x384xf32> to vector<8x128xf32>
    %252 = vector.broadcast %4 : vector<1x128xf32> to vector<8x128xf32>
    %253 = arith.addf %251, %252 : vector<8x128xf32>
    %254 = arith.mulf %241, %253 : vector<8x128xf32>
    %255 = arith.addf %250, %254 : vector<8x128xf32>
    %256 = math.tanh %255 : vector<8x128xf32>
    %cst_76 = arith.constant 1.000000e+00 : f32
    %257 = vector.broadcast %cst_76 : f32 to vector<8x128xf32>
    %258 = arith.subf %257, %249 : vector<8x128xf32>
    %259 = arith.mulf %258, %256 : vector<8x128xf32>
    %260 = arith.mulf %249, %230 : vector<8x128xf32>
    %261 = arith.addf %259, %260 : vector<8x128xf32>
    %c5_77 = arith.constant 5 : index
    %c0_78 = arith.constant 0 : index
    %c0_79 = arith.constant 0 : index
    %262 = vector.load %arg2[%c5_77, %c0_78, %c0_79] : memref<8x8x1xf32, #tpu.memory_space<vmem>>, vector<1x8x1xf32>
    %263 = vector.shape_cast %262 : vector<1x8x1xf32> to vector<8x1xf32>
    %264 = vector.broadcast %263 : vector<8x1xf32> to vector<8x128xf32>
    %265 = arith.mulf %264, %261 : vector<8x128xf32>
    %c5_80 = arith.constant 5 : index
    %c0_81 = arith.constant 0 : index
    %c0_82 = arith.constant 0 : index
    %266 = vector.load %arg5[%c5_80, %c0_81, %c0_82] : memref<8x8x128xf32, #tpu.memory_space<vmem>>, vector<1x8x128xf32>
    %267 = vector.shape_cast %266 : vector<1x8x128xf32> to vector<8x128xf32>
    %268 = vector.shape_cast %265 : vector<8x128xf32> to vector<1x8x128xf32>
    tpu.vector_store %arg5[%c5_80, %c0_81, %c0_82], %268 {strides = array<i32>} : memref<8x8x128xf32, #tpu.memory_space<vmem>>, vector<1x8x128xf32>,
    %269 = vector.broadcast %263 : vector<8x1xf32> to vector<8x128xf32>
    %270 = arith.mulf %269, %261 : vector<8x128xf32>
    %cst_83 = arith.constant 1.000000e+00 : f32
    %271 = vector.broadcast %cst_83 : f32 to vector<8x1xf32>
    %272 = arith.subf %271, %263 : vector<8x1xf32>
    %273 = vector.broadcast %272 : vector<8x1xf32> to vector<8x128xf32>
    %274 = arith.mulf %273, %230 : vector<8x128xf32>
    %275 = arith.addf %270, %274 : vector<8x128xf32>
    %c6 = arith.constant 6 : index
    %c0_84 = arith.constant 0 : index
    %c0_85 = arith.constant 0 : index
    %276 = vector.load %arg1[%c6, %c0_84, %c0_85] : memref<8x8x384xf32, #tpu.memory_space<vmem>>, vector<1x8x384xf32>
    %277 = vector.shape_cast %276 : vector<1x8x384xf32> to vector<8x384xf32>
    %cst_86 = arith.constant dense<0.000000e+00> : vector<8x384xf32>
    %278 = tpu.matmul %275, %3, %cst_86 {dimension_numbers = #tpu.dot_dimension_numbers<[1], [0], [0], [1], [0, 0, 1, 1], [], []>} : vector<8x128xf32>, vector<128x384xf32>, vector<8x384xf32> -> vector<8x384xf32>
    %279 = vector.extract_strided_slice %277 {offsets = [0, 0], sizes = [8, 128], strides = [1, 1]} : vector<8x384xf32> to vector<8x128xf32>
    %280 = vector.extract_strided_slice %278 {offsets = [0, 0], sizes = [8, 128], strides = [1, 1]} : vector<8x384xf32> to vector<8x128xf32>
    %281 = arith.addf %279, %280 : vector<8x128xf32>
    %282 = arith.negf %281 : vector<8x128xf32>
    %283 = math.exp %282 : vector<8x128xf32>
    %cst_87 = arith.constant 1.000000e+00 : f32
    %284 = vector.broadcast %cst_87 : f32 to vector<8x128xf32>
    %285 = arith.addf %284, %283 : vector<8x128xf32>
    %286 = arith.divf %284, %285 : vector<8x128xf32>
    %287 = vector.extract_strided_slice %277 {offsets = [0, 128], sizes = [8, 128], strides = [1, 1]} : vector<8x384xf32> to vector<8x128xf32>
    %288 = vector.extract_strided_slice %278 {offsets = [0, 128], sizes = [8, 128], strides = [1, 1]} : vector<8x384xf32> to vector<8x128xf32>
    %289 = arith.addf %287, %288 : vector<8x128xf32>
    %290 = arith.negf %289 : vector<8x128xf32>
    %291 = math.exp %290 : vector<8x128xf32>
    %cst_88 = arith.constant 1.000000e+00 : f32
    %292 = vector.broadcast %cst_88 : f32 to vector<8x128xf32>
    %293 = arith.addf %292, %291 : vector<8x128xf32>
    %294 = arith.divf %292, %293 : vector<8x128xf32>
    %295 = vector.extract_strided_slice %277 {offsets = [0, 256], sizes = [8, 128], strides = [1, 1]} : vector<8x384xf32> to vector<8x128xf32>
    %296 = vector.extract_strided_slice %278 {offsets = [0, 256], sizes = [8, 128], strides = [1, 1]} : vector<8x384xf32> to vector<8x128xf32>
    %297 = vector.broadcast %4 : vector<1x128xf32> to vector<8x128xf32>
    %298 = arith.addf %296, %297 : vector<8x128xf32>
    %299 = arith.mulf %286, %298 : vector<8x128xf32>
    %300 = arith.addf %295, %299 : vector<8x128xf32>
    %301 = math.tanh %300 : vector<8x128xf32>
    %cst_89 = arith.constant 1.000000e+00 : f32
    %302 = vector.broadcast %cst_89 : f32 to vector<8x128xf32>
    %303 = arith.subf %302, %294 : vector<8x128xf32>
    %304 = arith.mulf %303, %301 : vector<8x128xf32>
    %305 = arith.mulf %294, %275 : vector<8x128xf32>
    %306 = arith.addf %304, %305 : vector<8x128xf32>
    %c6_90 = arith.constant 6 : index
    %c0_91 = arith.constant 0 : index
    %c0_92 = arith.constant 0 : index
    %307 = vector.load %arg2[%c6_90, %c0_91, %c0_92] : memref<8x8x1xf32, #tpu.memory_space<vmem>>, vector<1x8x1xf32>
    %308 = vector.shape_cast %307 : vector<1x8x1xf32> to vector<8x1xf32>
    %309 = vector.broadcast %308 : vector<8x1xf32> to vector<8x128xf32>
    %310 = arith.mulf %309, %306 : vector<8x128xf32>
    %c6_93 = arith.constant 6 : index
    %c0_94 = arith.constant 0 : index
    %c0_95 = arith.constant 0 : index
    %311 = vector.load %arg5[%c6_93, %c0_94, %c0_95] : memref<8x8x128xf32, #tpu.memory_space<vmem>>, vector<1x8x128xf32>
    %312 = vector.shape_cast %311 : vector<1x8x128xf32> to vector<8x128xf32>
    %313 = vector.shape_cast %310 : vector<8x128xf32> to vector<1x8x128xf32>
    tpu.vector_store %arg5[%c6_93, %c0_94, %c0_95], %313 {strides = array<i32>} : memref<8x8x128xf32, #tpu.memory_space<vmem>>, vector<1x8x128xf32>,
    %314 = vector.broadcast %308 : vector<8x1xf32> to vector<8x128xf32>
    %315 = arith.mulf %314, %306 : vector<8x128xf32>
    %cst_96 = arith.constant 1.000000e+00 : f32
    %316 = vector.broadcast %cst_96 : f32 to vector<8x1xf32>
    %317 = arith.subf %316, %308 : vector<8x1xf32>
    %318 = vector.broadcast %317 : vector<8x1xf32> to vector<8x128xf32>
    %319 = arith.mulf %318, %275 : vector<8x128xf32>
    %320 = arith.addf %315, %319 : vector<8x128xf32>
    %c7 = arith.constant 7 : index
    %c0_97 = arith.constant 0 : index
    %c0_98 = arith.constant 0 : index
    %321 = vector.load %arg1[%c7, %c0_97, %c0_98] : memref<8x8x384xf32, #tpu.memory_space<vmem>>, vector<1x8x384xf32>
    %322 = vector.shape_cast %321 : vector<1x8x384xf32> to vector<8x384xf32>
    %cst_99 = arith.constant dense<0.000000e+00> : vector<8x384xf32>
    %323 = tpu.matmul %320, %3, %cst_99 {dimension_numbers = #tpu.dot_dimension_numbers<[1], [0], [0], [1], [0, 0, 1, 1], [], []>} : vector<8x128xf32>, vector<128x384xf32>, vector<8x384xf32> -> vector<8x384xf32>
    %324 = vector.extract_strided_slice %322 {offsets = [0, 0], sizes = [8, 128], strides = [1, 1]} : vector<8x384xf32> to vector<8x128xf32>
    %325 = vector.extract_strided_slice %323 {offsets = [0, 0], sizes = [8, 128], strides = [1, 1]} : vector<8x384xf32> to vector<8x128xf32>
    %326 = arith.addf %324, %325 : vector<8x128xf32>
    %327 = arith.negf %326 : vector<8x128xf32>
    %328 = math.exp %327 : vector<8x128xf32>
    %cst_100 = arith.constant 1.000000e+00 : f32
    %329 = vector.broadcast %cst_100 : f32 to vector<8x128xf32>
    %330 = arith.addf %329, %328 : vector<8x128xf32>
    %331 = arith.divf %329, %330 : vector<8x128xf32>
    %332 = vector.extract_strided_slice %322 {offsets = [0, 128], sizes = [8, 128], strides = [1, 1]} : vector<8x384xf32> to vector<8x128xf32>
    %333 = vector.extract_strided_slice %323 {offsets = [0, 128], sizes = [8, 128], strides = [1, 1]} : vector<8x384xf32> to vector<8x128xf32>
    %334 = arith.addf %332, %333 : vector<8x128xf32>
    %335 = arith.negf %334 : vector<8x128xf32>
    %336 = math.exp %335 : vector<8x128xf32>
    %cst_101 = arith.constant 1.000000e+00 : f32
    %337 = vector.broadcast %cst_101 : f32 to vector<8x128xf32>
    %338 = arith.addf %337, %336 : vector<8x128xf32>
    %339 = arith.divf %337, %338 : vector<8x128xf32>
    %340 = vector.extract_strided_slice %322 {offsets = [0, 256], sizes = [8, 128], strides = [1, 1]} : vector<8x384xf32> to vector<8x128xf32>
    %341 = vector.extract_strided_slice %323 {offsets = [0, 256], sizes = [8, 128], strides = [1, 1]} : vector<8x384xf32> to vector<8x128xf32>
    %342 = vector.broadcast %4 : vector<1x128xf32> to vector<8x128xf32>
    %343 = arith.addf %341, %342 : vector<8x128xf32>
    %344 = arith.mulf %331, %343 : vector<8x128xf32>
    %345 = arith.addf %340, %344 : vector<8x128xf32>
    %346 = math.tanh %345 : vector<8x128xf32>
    %cst_102 = arith.constant 1.000000e+00 : f32
    %347 = vector.broadcast %cst_102 : f32 to vector<8x128xf32>
    %348 = arith.subf %347, %339 : vector<8x128xf32>
    %349 = arith.mulf %348, %346 : vector<8x128xf32>
    %350 = arith.mulf %339, %320 : vector<8x128xf32>
    %351 = arith.addf %349, %350 : vector<8x128xf32>
    %c7_103 = arith.constant 7 : index
    %c0_104 = arith.constant 0 : index
    %c0_105 = arith.constant 0 : index
    %352 = vector.load %arg2[%c7_103, %c0_104, %c0_105] : memref<8x8x1xf32, #tpu.memory_space<vmem>>, vector<1x8x1xf32>
    %353 = vector.shape_cast %352 : vector<1x8x1xf32> to vector<8x1xf32>
    %354 = vector.broadcast %353 : vector<8x1xf32> to vector<8x128xf32>
    %355 = arith.mulf %354, %351 : vector<8x128xf32>
    %c7_106 = arith.constant 7 : index
    %c0_107 = arith.constant 0 : index
    %c0_108 = arith.constant 0 : index
    %356 = vector.load %arg5[%c7_106, %c0_107, %c0_108] : memref<8x8x128xf32, #tpu.memory_space<vmem>>, vector<1x8x128xf32>
    %357 = vector.shape_cast %356 : vector<1x8x128xf32> to vector<8x128xf32>
    %358 = vector.shape_cast %355 : vector<8x128xf32> to vector<1x8x128xf32>
    tpu.vector_store %arg5[%c7_106, %c0_107, %c0_108], %358 {strides = array<i32>} : memref<8x8x128xf32, #tpu.memory_space<vmem>>, vector<1x8x128xf32>,
    %359 = vector.broadcast %353 : vector<8x1xf32> to vector<8x128xf32>
    %360 = arith.mulf %359, %351 : vector<8x128xf32>
    %cst_109 = arith.constant 1.000000e+00 : f32
    %361 = vector.broadcast %cst_109 : f32 to vector<8x1xf32>
    %362 = arith.subf %361, %353 : vector<8x1xf32>
    %363 = vector.broadcast %362 : vector<8x1xf32> to vector<8x128xf32>
    %364 = arith.mulf %363, %320 : vector<8x128xf32>
    %365 = arith.addf %360, %364 : vector<8x128xf32>
    %c0_110 = arith.constant 0 : index
    %c0_111 = arith.constant 0 : index
    %366 = vector.load %arg7[%c0_110, %c0_111] : memref<8x128xf32, #tpu.memory_space<vmem>>, vector<8x128xf32>
    tpu.vector_store %arg7[%c0_110, %c0_111], %365 {strides = array<i32>} : memref<8x128xf32, #tpu.memory_space<vmem>>, vector<8x128xf32>,
    %c0_i32_112 = arith.constant 0 : i32
    %367 = arith.cmpi eq, %arg0, %c0_i32_112 : i32
    %368 = arith.extui %367 : i1 to i32
    %c0_i32_113 = arith.constant 0 : i32
    %369 = arith.cmpi ne, %368, %c0_i32_113 : i32
    scf.if %369 {
      %c0_114 = arith.constant 0 : index
      %c0_115 = arith.constant 0 : index
      %370 = vector.load %arg7[%c0_114, %c0_115] : memref<8x128xf32, #tpu.memory_space<vmem>>, vector<8x128xf32>
      %c0_116 = arith.constant 0 : index
      %c0_117 = arith.constant 0 : index
      %371 = vector.load %arg6[%c0_116, %c0_117] : memref<8x128xf32, #tpu.memory_space<vmem>>, vector<8x128xf32>
      tpu.vector_store %arg6[%c0_116, %c0_117], %370 {strides = array<i32>} : memref<8x128xf32, #tpu.memory_space<vmem>>, vector<8x128xf32>,
    } else {
    }
    return
  }
  func.func @transform_0(%arg0: i32) -> (i32, i32, i32) {
    %c0_i32 = arith.constant 0 : i32
    %c0_i32_0 = arith.constant 0 : i32
    %c0_i32_1 = arith.constant 0 : i32
    return %arg0, %c0_i32, %c0_i32_0 : i32, i32, i32
  }
  func.func @transform_1(%arg0: i32) -> (i32, i32, i32) {
    %c0_i32 = arith.constant 0 : i32
    %c0_i32_0 = arith.constant 0 : i32
    %c0_i32_1 = arith.constant 0 : i32
    return %arg0, %c0_i32, %c0_i32_0 : i32, i32, i32
  }
  func.func @transform_2(%arg0: i32) -> (i32, i32) {
    %c0_i32 = arith.constant 0 : i32
    %c0_i32_0 = arith.constant 0 : i32
    %c0_i32_1 = arith.constant 0 : i32
    return %c0_i32, %c0_i32_0 : i32, i32
  }
  func.func @transform_3(%arg0: i32) -> (i32, i32) {
    %c0_i32 = arith.constant 0 : i32
    %c0_i32_0 = arith.constant 0 : i32
    %c0_i32_1 = arith.constant 0 : i32
    return %c0_i32, %c0_i32_0 : i32, i32
  }
  func.func @transform_4(%arg0: i32) -> (i32, i32, i32) {
    %c0_i32 = arith.constant 0 : i32
    %c0_i32_0 = arith.constant 0 : i32
    %c0_i32_1 = arith.constant 0 : i32
    return %arg0, %c0_i32, %c0_i32_0 : i32, i32, i32
  }
  func.func @transform_5(%arg0: i32) -> (i32, i32) {
    %c0_i32 = arith.constant 0 : i32
    %c0_i32_0 = arith.constant 0 : i32
    %c0_i32_1 = arith.constant 0 : i32
    return %c0_i32, %c0_i32_0 : i32, i32
  }
}

</mosaic_0001>

<bundles_post_ra>
// kernel: encoder_forward.1
= control target key start
LH: loop header
LB: loop body
LE: loop exit
PB: predicated region body
PF: predicated region fallthrough
CT: control target
= control target key end

     0   :  { %v1314_v6 = vmov 0   ;;  %v1315_v51 = vmov 0.0   ;;  %s2386_s2 = inlined_call_operand.vmem [shape: f32[128,384], index: 2, kind: input, shape index: {}]   ;;  %s2387_s1 = inlined_call_operand.vmem [shape: f32[8,8,1], index: 1, kind: input, shape index: {}]   ;;  %s2388_s3 = inlined_call_operand.vmem [shape: f32[1,128], index: 3, kind: input, shape index: {}]   ;;  %s2389_s0 = inlined_call_operand.vmem [shape: f32[8,8,384], index: 0, kind: input, shape index: {}]   ;;  %s2390_s4 = inlined_call_operand.vmem [shape: f32[8,8,128], index: 4, kind: output, shape index: {0}]   ;;  %s2391_s5 = inlined_call_operand.vmem [shape: f32[8,128], index: 5, kind: output, shape index: {1}]  }
   0x1   :  { %v1349_v0 = vld [vmem:[%s2386_s2 + $0x168] sm:$0xff]  ;;  %v1354_v1 = vld [vmem:[%s2386_s2 + $0x170] sm:$0xff]  ;;  %v1366_v3 = vld [vmem:[%s2386_s2 + $0x158] sm:$0xff]  ;;  %1181 = vset.pattern.permute.xlu0 %v1314_v6  ;;  %1182 = vset.pattern.permute.xlu1 %v1314_v6 }
   0x2   :  { %v1359_v2 = vld [vmem:[%s2386_s2 + $0x150] sm:$0xff]  ;;  %77 = vmatpush.msra.mxu0 %v1349_v0  ;;  %97 = vmatpush.msra.mxu1 %v1354_v1  ;;  %v1371_v4 = vld [vmem:[%s2386_s2 + $0x138] sm:$0xff]  ;;  %v1376_v5 = vld [vmem:[%s2386_s2 + $0x140] sm:$0xff] }
   0x3   :  { %v1383_v7 = vld [vmem:[%s2386_s2 + $0x120] sm:$0xff]  ;;  %v1388_v8 = vld [vmem:[%s2386_s2 + $0x128] sm:$0xff]  ;;  %208 = vmatpush.msra.mxu3 %v1349_v0  ;;  %1183 = vset.pattern.permute.xlu2 %v1314_v6  ;;  %v1401_v10 = vld [vmem:[%s2386_s2 + $0x110] sm:$0xff] }
   0x4   :  { %78 = vmatpush.msra.mxu0 %v1359_v2  ;;  %98 = vmatpush.msra.mxu1 %v1366_v3  ;;  %v1396_v9 = vld [vmem:[%s2386_s2 + $0x108] sm:$0xff]  ;;  %v1409_v11 = vld [vmem:[%s2386_s2 + $0xf0] sm:$0xff]  ;;  %v1414_v12 = vld [vmem:[%s2386_s2 + $0xf8] sm:$0xff] }
   0x5   :  { %209 = vmatpush.msra.mxu3 %v1359_v2  ;;  %v1419_v13 = vld [vmem:[%s2386_s2 + $0x178] sm:$0xff]  ;;  %v1427_v14 = vld [vmem:[%s2386_s2 + $0x160] sm:$0xff]  ;;  %v1446_v17 = vld [vmem:[%s2386_s2 + $0x148] sm:$0xff] }
   0x6   :  { %79 = vmatpush.msra.mxu0 %v1371_v4  ;;  %99 = vmatpush.msra.mxu1 %v1376_v5  ;;  %v1432_v15 = vld [vmem:[%s2386_s2 + $0xd8] sm:$0xff]  ;;  %v1437_v16 = vld [vmem:[%s2386_s2 + $0xe0] sm:$0xff]  ;;  %v1456_v19 = vld [vmem:[%s2386_s2 + $0xc8] sm:$0xff] }
   0x7   :  { %210 = vmatpush.msra.mxu3 %v1371_v4  ;;  %117 = vmatpush.msra.mxu2 %v1419_v13  ;;  %v1451_v18 = vld [vmem:[%s2386_s2 + $0xc0] sm:$0xff]  ;;  %v1465_v20 = vld [vmem:[%s2386_s2 + $0x130] sm:$0xff]  ;;  %v1473_v22 = vld [vmem:[%s2386_s2 + $0xa8] sm:$0xff] }
   0x8   :  { %80 = vmatpush.msra.mxu0 %v1383_v7  ;;  %100 = vmatpush.msra.mxu1 %v1388_v8  ;;  %v188_v21 = vld [vmem:[%s2387_s1] sm:$0xff]  ;;  %v1478_v23 = vld [vmem:[%s2386_s2 + $0xb0] sm:$0xff]  ;;  %v1486_v24 = vld [vmem:[%s2386_s2 + $0x118] sm:$0xff] }
   0x9   :  { %211 = vmatpush.msra.mxu3 %v1383_v7  ;;  %118 = vmatpush.msra.mxu2 %v1427_v14  ;;  %v1491_v25 = vld [vmem:[%s2386_s2 + $0x90] sm:$0xff]  ;;  %v1496_v26 = vld [vmem:[%s2386_s2 + $0x98] sm:$0xff]  ;;  %v1505_v27 = vld [vmem:[%s2386_s2 + $0x100] sm:$0xff]  ;;  %v196_v30 = vsub.f32 1.0, %v188_v21 }
   0xa   :  { %81 = vmatpush.msra.mxu0 %v1396_v9  ;;  %101 = vmatpush.msra.mxu1 %v1401_v10  ;;  %v1510_v28 = vld [vmem:[%s2386_s2 + $0x78] sm:$0xff]  ;;  %v1515_v29 = vld [vmem:[%s2386_s2 + $0x80] sm:$0xff]  ;;  %v1524_v31 = vld [vmem:[%s2386_s2 + $0xe8] sm:$0xff] }
   0xb   :  { %212 = vmatpush.msra.mxu3 %v1396_v9  ;;  %119 = vmatpush.msra.mxu2 %v1446_v17  ;;  %v1529_v32 = vld [vmem:[%s2386_s2 + $0x60] sm:$0xff]  ;;  %v1534_v33 = vld [vmem:[%s2386_s2 + $0x68] sm:$0xff]  ;;  %v1543_v34 = vld [vmem:[%s2386_s2 + $0xd0] sm:$0xff] }
   0xc   :  { %82 = vmatpush.msra.mxu0 %v1409_v11  ;;  %102 = vmatpush.msra.mxu1 %v1414_v12  ;;  %v1548_v35 = vld [vmem:[%s2386_s2 + $0x48] sm:$0xff]  ;;  %v1553_v36 = vld [vmem:[%s2386_s2 + $0x50] sm:$0xff]  ;;  %v1564_v38 = vld [vmem:[%s2386_s2 + $0xb8] sm:$0xff] }
   0xd   :  { %191 = vperm.xlu0 %1181, %v188_v21   ;;  %120 = vmatpush.msra.mxu2 %v1465_v20  ;;  %2412 = vst [vmem:[#allocation3_spill] sm:$0xff] %v1553_v36  ;;  %v1135_v37 = vld [vmem:[%s2387_s1 + $0x8] sm:$0xff]  ;;  %v1569_v39 = vld [vmem:[%s2386_s2 + $0x30] sm:$0xff]  ;;  %v1574_v40 = vld [vmem:[%s2386_s2 + $0x38] sm:$0xff] }
   0xe   :  { %83 = vmatpush.msra.mxu0 %v1432_v15  ;;  %103 = vmatpush.msra.mxu1 %v1437_v16  ;;  %2413 = vst [vmem:[#allocation4_spill] sm:$0xff] %v1569_v39  ;;  %v1582_v41 = vld [vmem:[%s2386_s2 + $0xa0] sm:$0xff]  ;;  %v1587_v42 = vld [vmem:[%s2386_s2 + $0x18] sm:$0xff]  ;;  %v1601_v44 = vld [vmem:[%s2386_s2 + $0x88] sm:$0xff]  ;;  %v326_v48 = vsub.f32 1.0, %v1135_v37 }
   0xf   :  { %213 = vmatpush.msra.mxu3 %v1409_v11  ;;  %121 = vmatpush.msra.mxu2 %v1486_v24  ;;  %2414 = vst [vmem:[#allocation5_spill] sm:$0xff] %v1574_v40  ;;  %v1592_v43 = vld [vmem:[%s2386_s2 + $0x20] sm:$0xff]  ;;  %v1149_v45 = vld [vmem:[%s2387_s1 + $0x18] sm:$0xff]  ;;  %v1614_v47 = vld [vmem:[%s2386_s2 + $0x8] sm:$0xff] }
  0x10   :  { %84 = vmatpush.msra.mxu0 %v1451_v18  ;;  %104 = vmatpush.msra.mxu1 %v1456_v19  ;;  %2415 = vst [vmem:[#allocation6_spill] sm:$0xff] %v1587_v42  ;;  %v1609_v46 = vld [vmem:[%s2386_s2] sm:$0xff]  ;;  %v1624_v49 = vld [vmem:[%s2386_s2 + $0x70] sm:$0xff]  ;;  %v1636_v52 = vld [vmem:[%s2386_s2 + $0x58] sm:$0xff]  ;;  %v586_v57 = vsub.f32 1.0, %v1149_v45 }
  0x11   :  { %214 = vmatpush.msra.mxu3 %v1432_v15  ;;  %122 = vmatpush.msra.mxu2 %v1505_v27  ;;  %2416 = vst [vmem:[#allocation7_spill] sm:$0xff] %v1592_v43  ;;  %v1631_v50 = vld [vmem:[%s2387_s1 + $0x20] sm:$0xff]  ;;  %v1652_v55 = vld [vmem:[%s2386_s2 + $0x28] sm:$0xff]  ;;  %v1661_v56 = vld [vmem:[%s2386_s2 + $0x10] sm:$0xff] }
  0x12   :  { %85 = vmatpush.msra.mxu0 %v1473_v22  ;;  %105 = vmatpush.msra.mxu1 %v1478_v23  ;;  %2417 = vst [vmem:[#allocation8_spill] sm:$0xff] %v1609_v46  ;;  %v1642_v53 = vld [vmem:[%s2386_s2 + $0x40] sm:$0xff]  ;;  %v716_v54 = vsub.f32 1.0, %v1631_v50  ;;  %v1674_v58 = vld [vmem:[%s2387_s1 + $0x30] sm:$0xff]  ;;  %v1686_v59 = vld [vmem:[%s2387_s1 + $0x38] sm:$0xff] }
  0x13   :  { %215 = vmatpush.msra.mxu3 %v1451_v18  ;;  %123 = vmatpush.msra.mxu2 %v1524_v31  ;;  %2418 = vst [vmem:[#allocation9_spill] sm:$0xff] %v1614_v47  ;;  %v1106_v60 = vsub.f32 1.0, %v1686_v59  ;;  %v74_v61 = vld [vmem:[%s2389_s0] sm:$0xff]  ;;  %v75_v62 = vld [vmem:[%s2389_s0 + $0x8] sm:$0xff] }
  0x14   :  { %86 = vmatpush.msra.mxu0 %v1491_v25  ;;  %106 = vmatpush.msra.mxu1 %v1496_v26  ;;  %2419 = vst [vmem:[#allocation10_spill] sm:$0xff] %v1652_v55 }
  0x15   :  { %199 = vperm.xlu0 %1181, %v196_v30   ;;  %124 = vmatpush.msra.mxu2 %v1543_v34  ;;  %2420 = vst [vmem:[#allocation11_spill] sm:$0xff] %v1661_v56 }
  0x16   :  { %87 = vmatpush.msra.mxu0 %v1510_v28  ;;  %107 = vmatpush.msra.mxu1 %v1515_v29 }
  0x17   :  { %320 = vperm.xlu1 %1182, %v1135_v37   ;;  %125 = vmatpush.msra.mxu2 %v1564_v38 }
  0x18   :  { %88 = vmatpush.msra.mxu0 %v1529_v32  ;;  %108 = vmatpush.msra.mxu1 %v1534_v33 }
  0x19   :  { %216 = vmatpush.msra.mxu3 %v1473_v22  ;;  %126 = vmatpush.msra.mxu2 %v1582_v41 }
  0x1a   :  { %89 = vmatpush.msra.mxu0 %v1548_v35  ;;  %109 = vmatpush.msra.mxu1 %v1553_v36 }
  0x1b   :  { %217 = vmatpush.msra.mxu3 %v1491_v25  ;;  %127 = vmatpush.msra.mxu2 %v1601_v44 }
  0x1c   :  { %90 = vmatpush.msra.mxu0 %v1569_v39  ;;  %110 = vmatpush.msra.mxu1 %v1574_v40 }
  0x1d   :  { %580 = vperm.xlu0 %1181, %v1149_v45   ;;  %128 = vmatpush.msra.mxu2 %v1624_v49 }
  0x1e   :  { %91 = vmatpush.msra.mxu0 %v1587_v42  ;;  %111 = vmatpush.msra.mxu1 %v1592_v43 }
  0x1f   :  { %329 = vperm.xlu1 %1182, %v326_v48   ;;  %129 = vmatpush.msra.mxu2 %v1636_v52 }
  0x20   :  { %92 = vmatpush.msra.mxu0 %v1609_v46  ;;  %112 = vmatpush.msra.mxu1 %v1614_v47 }
  0x21   :  { %93 = vmatmul.f32.vlgmr.msra.gmra.mxu0 %v1315_v51  ;;  %113 = vmatmul.f32.vlgmr.msra.gmra.mxu1 %v1315_v51 }
  0x22   :  { %228 = vmatpush.msrb.mxu0 %v1354_v1  ;;  %248 = vmatpush.msrb.mxu1 %v1419_v13 }
  0x23   :  { %218 = vmatpush.msra.mxu3 %v1510_v28  ;;  %130 = vmatpush.msra.mxu2 %v1642_v53 }
  0x24   :  { %229 = vmatpush.msrb.mxu0 %v1366_v3  ;;  %249 = vmatpush.msrb.mxu1 %v1427_v14 }
  0x25   :  { %219 = vmatpush.msra.mxu3 %v1529_v32  ;;  %719 = vperm.xlu0 %1181, %v716_v54  }
  0x26   :  { %230 = vmatpush.msrb.mxu0 %v1376_v5  ;;  %131 = vmatpush.msra.mxu2 %v1652_v55 }
  0x27   :  { %250 = vmatpush.msrb.mxu1 %v1446_v17  ;;  %220 = vmatpush.msra.mxu3 %v1548_v35 }
  0x28   :  { %231 = vmatpush.msrb.mxu0 %v1388_v8  ;;  %132 = vmatpush.msra.mxu2 %v1661_v56 }
  0x29   :  { %251 = vmatpush.msrb.mxu1 %v1465_v20  ;;  %133 = vmatmul.f32.vlgmr.msra.gmra.mxu2 %v1315_v51 }
  0x2a   :  { %232 = vmatpush.msrb.mxu0 %v1401_v10  ;;  %221 = vmatpush.msra.mxu3 %v1569_v39 }
  0x2b   :  { %252 = vmatpush.msrb.mxu1 %v1486_v24  ;;  %589 = vperm.xlu1 %1182, %v586_v57  }
  0x2c   :  { %233 = vmatpush.msrb.mxu0 %v1414_v12  ;;  %222 = vmatpush.msra.mxu3 %v1587_v42 }
  0x2d   :  { %253 = vmatpush.msrb.mxu1 %v1505_v27  ;;  %970 = vperm.xlu0 %1181, %v1674_v58  }
  0x2e   :  { %234 = vmatpush.msrb.mxu0 %v1437_v16  ;;  %223 = vmatpush.msra.mxu3 %v1609_v46 }
  0x2f   :  { %254 = vmatpush.msrb.mxu1 %v1524_v31  ;;  %338 = vmatpush.msrb.mxu2 %v1349_v0 }
  0x30   :  { %235 = vmatpush.msrb.mxu0 %v1456_v19  ;;  %358 = vmatpush.msrb.mxu3 %v1354_v1 }
  0x31   :  { %255 = vmatpush.msrb.mxu1 %v1543_v34  ;;  %339 = vmatpush.msrb.mxu2 %v1359_v2 }
  0x32   :  { %236 = vmatpush.msrb.mxu0 %v1478_v23  ;;  %359 = vmatpush.msrb.mxu3 %v1366_v3 }
  0x33   :  { %256 = vmatpush.msrb.mxu1 %v1564_v38  ;;  %340 = vmatpush.msrb.mxu2 %v1371_v4 }
  0x34   :  { %237 = vmatpush.msrb.mxu0 %v1496_v26  ;;  %360 = vmatpush.msrb.mxu3 %v1376_v5 }
  0x35   :  { %257 = vmatpush.msrb.mxu1 %v1582_v41  ;;  %1109 = vperm.xlu0 %1181, %v1106_v60   ;;  %v1163_v60 = vld [vmem:[%s2387_s1 + $0x28] sm:$0xff] }
  0x36   :  { %238 = vmatpush.msrb.mxu0 %v1515_v29  ;;  %341 = vmatpush.msrb.mxu2 %v1383_v7 }
  0x37   :  { %258 = vmatpush.msrb.mxu1 %v1601_v44  ;;  %361 = vmatpush.msrb.mxu3 %v1388_v8 }
  0x38   :  { %239 = vmatpush.msrb.mxu0 %v1534_v33  ;;  %342 = vmatpush.msrb.mxu2 %v1396_v9 }
  0x39   :  { %259 = vmatpush.msrb.mxu1 %v1624_v49  ;;  %362 = vmatpush.msrb.mxu3 %v1401_v10 }
  0x3a   :  { %240 = vmatpush.msrb.mxu0 %v1553_v36  ;;  %343 = vmatpush.msrb.mxu2 %v1409_v11 }
  0x3b   :  { %260 = vmatpush.msrb.mxu1 %v1636_v52  ;;  %363 = vmatpush.msrb.mxu3 %v1414_v12 }
  0x3c   :  { %241 = vmatpush.msrb.mxu0 %v1574_v40  ;;  %344 = vmatpush.msrb.mxu2 %v1432_v15 }
  0x3d   :  { %261 = vmatpush.msrb.mxu1 %v1642_v53  ;;  %364 = vmatpush.msrb.mxu3 %v1437_v16 }
  0x3e   :  { %242 = vmatpush.msrb.mxu0 %v1592_v43  ;;  %345 = vmatpush.msrb.mxu2 %v1451_v18 }
  0x3f   :  { %262 = vmatpush.msrb.mxu1 %v1652_v55  ;;  %365 = vmatpush.msrb.mxu3 %v1456_v19 }
  0x40   :  { %243 = vmatpush.msrb.mxu0 %v1614_v47  ;;  %346 = vmatpush.msrb.mxu2 %v1473_v22 }
  0x41   :  { %263 = vmatpush.msrb.mxu1 %v1661_v56  ;;  %366 = vmatpush.msrb.mxu3 %v1478_v23 }
  0x42   :  { %378 = vmatpush.msra.mxu0 %v1419_v13  ;;  %347 = vmatpush.msrb.mxu2 %v1491_v25 }
  0x43   :  { %468 = vmatpush.msra.mxu1 %v1349_v0  ;;  %367 = vmatpush.msrb.mxu3 %v1496_v26 }
  0x44   :  { %379 = vmatpush.msra.mxu0 %v1427_v14  ;;  %348 = vmatpush.msrb.mxu2 %v1510_v28 }
  0x45   :  { %469 = vmatpush.msra.mxu1 %v1359_v2  ;;  %368 = vmatpush.msrb.mxu3 %v1515_v29 }
  0x46   :  { %380 = vmatpush.msra.mxu0 %v1446_v17  ;;  %349 = vmatpush.msrb.mxu2 %v1529_v32 }
  0x47   :  { %470 = vmatpush.msra.mxu1 %v1371_v4  ;;  %369 = vmatpush.msrb.mxu3 %v1534_v33 }
  0x48   :  { %381 = vmatpush.msra.mxu0 %v1465_v20  ;;  %350 = vmatpush.msrb.mxu2 %v1548_v35 }
  0x49   :  { %471 = vmatpush.msra.mxu1 %v1383_v7  ;;  %370 = vmatpush.msrb.mxu3 %v1553_v36 }
  0x4a   :  { %382 = vmatpush.msra.mxu0 %v1486_v24  ;;  %351 = vmatpush.msrb.mxu2 %v1569_v39 }
  0x4b   :  { %472 = vmatpush.msra.mxu1 %v1396_v9  ;;  %371 = vmatpush.msrb.mxu3 %v1574_v40 }
  0x4c   :  { %383 = vmatpush.msra.mxu0 %v1505_v27  ;;  %352 = vmatpush.msrb.mxu2 %v1587_v42 }
  0x4d   :  { %473 = vmatpush.msra.mxu1 %v1409_v11  ;;  %372 = vmatpush.msrb.mxu3 %v1592_v43 }
  0x4e   :  { %384 = vmatpush.msra.mxu0 %v1524_v31  ;;  %353 = vmatpush.msrb.mxu2 %v1609_v46 }
  0x4f   :  { %474 = vmatpush.msra.mxu1 %v1432_v15  ;;  %373 = vmatpush.msrb.mxu3 %v1614_v47 }
  0x50   :  { %385 = vmatpush.msra.mxu0 %v1543_v34  ;;  %488 = vmatpush.msra.mxu2 %v1354_v1 }
  0x51   :  { %475 = vmatpush.msra.mxu1 %v1451_v18  ;;  %840 = vperm.xlu1 %1182, %v1163_v60  }
  0x52   :  { %386 = vmatpush.msra.mxu0 %v1564_v38  ;;  %489 = vmatpush.msra.mxu2 %v1366_v3 }
  0x53   :  { %476 = vmatpush.msra.mxu1 %v1473_v22 }
  0x54   :  { %387 = vmatpush.msra.mxu0 %v1582_v41  ;;  %490 = vmatpush.msra.mxu2 %v1376_v5 }
  0x55   :  { %477 = vmatpush.msra.mxu1 %v1491_v25 }
  0x56   :  { %388 = vmatpush.msra.mxu0 %v1601_v44  ;;  %491 = vmatpush.msra.mxu2 %v1388_v8 }
  0x57   :  { %478 = vmatpush.msra.mxu1 %v1510_v28 }
  0x58   :  { %389 = vmatpush.msra.mxu0 %v1624_v49  ;;  %492 = vmatpush.msra.mxu2 %v1401_v10 }
  0x59   :  { %479 = vmatpush.msra.mxu1 %v1529_v32 }
  0x5a   :  { %390 = vmatpush.msra.mxu0 %v1636_v52  ;;  %493 = vmatpush.msra.mxu2 %v1414_v12 }
  0x5b   :  { %480 = vmatpush.msra.mxu1 %v1548_v35 }
  0x5c   :  { %391 = vmatpush.msra.mxu0 %v1642_v53  ;;  %494 = vmatpush.msra.mxu2 %v1437_v16 }
  0x5d   :  { %481 = vmatpush.msra.mxu1 %v1569_v39 }
  0x5e   :  { %392 = vmatpush.msra.mxu0 %v1652_v55  ;;  %495 = vmatpush.msra.mxu2 %v1456_v19 }
  0x5f   :  { %482 = vmatpush.msra.mxu1 %v1587_v42 }
  0x60   :  { %393 = vmatpush.msra.mxu0 %v1661_v56  ;;  %496 = vmatpush.msra.mxu2 %v1478_v23 }
  0x61   :  { %483 = vmatpush.msra.mxu1 %v1609_v46 }
  0x62   :  { %497 = vmatpush.msra.mxu2 %v1496_v26 }
  0x64   :  { %498 = vmatpush.msra.mxu2 %v1515_v29 }
  0x66   :  { %499 = vmatpush.msra.mxu2 %v1534_v33 }
  0x68   :  { %500 = vmatpush.msra.mxu2 %v1553_v36 }
  0x6a   :  { %501 = vmatpush.msra.mxu2 %v1574_v40 }
  0x6c   :  { %502 = vmatpush.msra.mxu2 %v1592_v43 }
  0x6e   :  { %503 = vmatpush.msra.mxu2 %v1614_v47  ;;  %v1142_v47 = vld [vmem:[%s2387_s1 + $0x10] sm:$0xff] }
  0x6f   :  { %450 = vperm.xlu2 %1183, %v1142_v47   ;;  %v456_v46 = vsub.f32 1.0, %v1142_v47  ;;  %v76_v47 = vld [vmem:[%s2389_s0 + $0x10] sm:$0xff] }
  0x77   :  { %459 = vperm.xlu2 %1183, %v456_v46   ;;  %v846_v46 = vsub.f32 1.0, %v1163_v60  ;;  %v2424_v60 = vld [vmem:[#allocation10_spill] sm:$0xff] }
  0x7f   :  { %710 = vperm.xlu2 %1183, %v1631_v50   ;;  %v2422_v50 = vld [vmem:[#allocation3_spill] sm:$0xff] }
  0x87   :  { %849 = vperm.xlu2 %1183, %v846_v46  }
  0x8f   :  { %1100 = vperm.xlu2 %1183, %v1686_v59   ;;  %v2423_v59 = vld [vmem:[#allocation4_spill] sm:$0xff] }
  0x9e   :  { %v94_v63 = vpop.f32.mrf.mxu0  ;;  %v114_v6 = vpop.f32.mrf.mxu1 }
  0x9f   :  { %v137_v21 = vadd.f32 %v94_v63, %v74_v61  ;;  %v157_v30 = vadd.f32 %v114_v6, %v75_v62 }
  0xa1   :  { %v1128_v37 = vmul.f32 -1.442695, %v137_v21  ;;  %v1129_v45 = vmul.f32 -1.442695, %v157_v30  ;;  %v1804_v30 = vld [vmem:[%s2388_s3] ss:$0 sm:$0xff] }
  0xa2   :  { %2421 = vst [vmem:[#allocation12_spill] sm:$0xff] %v1804_v30 }
  0xa3   :  { %1185 = vpow2.f32 %v1128_v37  ;;  %v976_v37 = vsub.f32 1.0, %v1674_v58 }
  0xa4   :  { %1187 = vpow2.f32 %v1129_v45 }
  0xa5   :  { %979 = vperm.xlu1 %1182, %v976_v37  }
  0xa9   :  { %v1186_v48 = vpop.eup %1185 }
  0xaa   :  { %v1188_v51 = vpop.eup %1187  ;;  %v141_v54 = vadd.f32 1.0, %v1186_v48 }
  0xab   :  { %v161_v57 = vadd.f32 1.0, %v1188_v51 }
  0xac   :  { %1189 = vrcp.f32 %v141_v54  ;;  %v134_v48 = vpop.f32.mrf.mxu2  ;;  %v153_v51 = vand.u32 2147483648, %v141_v54  ;;  %v151_v56 = vand.u32 2147483647, %v141_v54  ;;  %vm147_vm1 = vweird.f32 %v141_v54 }
  0xad   :  { %1191 = vrcp.f32 %v161_v57  ;;  %v180_v55 = vadd.f32 %v1804_v30, %v134_v48  ;;  %vm167_vm4 = vweird.f32 %v161_v57  ;;  %v192_v48 = vpop.permute.xlu0 %191 }
  0xae   :  { %vm152_vm3 = vcmp.eq.f32.partialorder %v151_v56, 8.507059e+37 }
  0xb2   :  { %v1190_v61 = vpop.eup %1189 }
  0xb3   :  { %v1192_v62 = vpop.eup %1191  ;;  %v143_v63 = vmul.f32 %v1190_v61, %v141_v54  ;;  %vm148_vm0 = vweird.f32 %v1190_v61 }
  0xb4   :  { %v163_v6 = vmul.f32 %v1192_v62, %v161_v57  ;;  %vm149_vm2 = vmor %vm147_vm1, %vm148_vm0  ;;  %vm168_vm5 = vweird.f32 %v1192_v62 }
  0xb5   :  { %v144_v21 = vsub.f32 1.0, %v143_v63  ;;  %v154_v63 = vor.u32 1.1754944e-38, %v153_v51  ;;  %vm169_vm6 = vmor %vm167_vm4, %vm168_vm5 }
  0xb6   :  { %v164_v45 = vsub.f32 1.0, %v163_v6  ;;  %v173_v6 = vand.u32 2147483648, %v161_v57 }
  0xb7   :  { %v145_v43 = vmul.f32 %v1190_v61, %v144_v21 }
  0xb8   :  { %v165_v42 = vmul.f32 %v1192_v62, %v164_v45  ;;  %v174_v51 = vor.u32 1.1754944e-38, %v173_v6  ;;  %v2430_v6 = vld [vmem:[#allocation9_spill] sm:$0xff] }
  0xb9   :  { %v146_v40 = vadd.f32 %v1190_v61, %v145_v43  ;;  %v171_v43 = vand.u32 2147483647, %v161_v57 }
  0xba   :  { %v166_v36 = vadd.f32 %v1192_v62, %v165_v42 }
  0xbb   :  { %v150_v39 = vsel %vm149_vm2, %v1190_v61, %v146_v40  ;;  %vm172_vm7 = vcmp.eq.f32.partialorder %v171_v43, 8.507059e+37 }
  0xbc   :  { %v155_v58 = vsel %vm152_vm3, %v154_v63, %v150_v39  ;;  %v170_v45 = vsel %vm169_vm6, %v1192_v62, %v166_v36  ;;  %v200_v39 = vpop.permute.xlu0 %199  ;;  %v2425_v62 = vld [vmem:[#allocation5_spill] sm:$0xff]  ;;  %v2427_v63 = vld [vmem:[#allocation11_spill] sm:$0xff] }
  0xbd   :  { %v181_v21 = vmul.f32 %v180_v55, %v155_v58  ;;  %v175_v40 = vsel %vm172_vm7, %v174_v51, %v170_v45  ;;  %v202_v55 = vmul.f32 0.0, %v200_v39  ;;  %v2429_v58 = vld [vmem:[#allocation8_spill] sm:$0xff] }
  0xbe   :  { %v184_v42 = vsub.f32 1.0, %v175_v40  ;;  %v186_v37 = vmul.f32 0.0, %v175_v40 }
  0xbf   :  { %v182_v54 = vadd.f32 %v181_v21, %v76_v47  ;;  %v2428_v47 = vld [vmem:[#allocation7_spill] sm:$0xff] }
  0xc0   :  { %v1131_v21 = vld [vmem:[%s2389_s0 + $0x20] sm:$0xff] }
  0xc1   :  { %1193 = vtanh.f32 %v182_v54 }
  0xc7   :  { %v1194_v56 = vpop.eup %1193 }
  0xc8   :  { %v185_v61 = vmul.f32 %v1194_v56, %v184_v42 }
  0xca   :  { %v187_v30 = vadd.f32 %v186_v37, %v185_v61 }
  0xcc   :  { %v194_v57 = vmul.f32 %v192_v48, %v187_v30  ;;  %v2426_v30 = vld [vmem:[#allocation6_spill] sm:$0xff] }
  0xcd   :  { %v1130_v48 = vld [vmem:[%s2389_s0 + $0x18] sm:$0xff] }
  0xce   :  { %195 = vst [vmem:[%s2390_s4] sm:$0xff] %v194_v57  ;;  %v1815_v36 = vadd.f32 %v202_v55, %v194_v57 }
  0xd0   :  { %224 = vmatmul.f32.vlgmr.msra.gmra.mxu3 %v1815_v36  ;;  %244 = vmatmul.f32.vlgmr.msrb.gmra.mxu0 %v1815_v36 }
  0xd1   :  { %264 = vmatmul.f32.vlgmr.msrb.gmra.mxu1 %v1815_v36  ;;  %508 = vmatpush.msra.mxu3 %v1419_v13 }
  0xd2   :  { %598 = vmatpush.msrb.mxu0 %v1349_v0  ;;  %618 = vmatpush.msrb.mxu1 %v1354_v1 }
  0xd3   :  { %509 = vmatpush.msra.mxu3 %v1427_v14 }
  0xd4   :  { %599 = vmatpush.msrb.mxu0 %v1359_v2  ;;  %619 = vmatpush.msrb.mxu1 %v1366_v3 }
  0xd5   :  { %510 = vmatpush.msra.mxu3 %v1446_v17 }
  0xd6   :  { %600 = vmatpush.msrb.mxu0 %v1371_v4  ;;  %620 = vmatpush.msrb.mxu1 %v1376_v5 }
  0xd7   :  { %511 = vmatpush.msra.mxu3 %v1465_v20 }
  0xd8   :  { %601 = vmatpush.msrb.mxu0 %v1383_v7  ;;  %621 = vmatpush.msrb.mxu1 %v1388_v8 }
  0xd9   :  { %512 = vmatpush.msra.mxu3 %v1486_v24 }
  0xda   :  { %602 = vmatpush.msrb.mxu0 %v1396_v9  ;;  %622 = vmatpush.msrb.mxu1 %v1401_v10 }
  0xdb   :  { %513 = vmatpush.msra.mxu3 %v1505_v27 }
  0xdc   :  { %603 = vmatpush.msrb.mxu0 %v1409_v11  ;;  %623 = vmatpush.msrb.mxu1 %v1414_v12 }
  0xdd   :  { %514 = vmatpush.msra.mxu3 %v1524_v31 }
  0xde   :  { %604 = vmatpush.msrb.mxu0 %v1432_v15  ;;  %624 = vmatpush.msrb.mxu1 %v1437_v16 }
  0xdf   :  { %515 = vmatpush.msra.mxu3 %v1543_v34 }
  0xe0   :  { %605 = vmatpush.msrb.mxu0 %v1451_v18  ;;  %625 = vmatpush.msrb.mxu1 %v1456_v19 }
  0xe1   :  { %516 = vmatpush.msra.mxu3 %v1564_v38 }
  0xe2   :  { %606 = vmatpush.msrb.mxu0 %v1473_v22  ;;  %626 = vmatpush.msrb.mxu1 %v1478_v23 }
  0xe3   :  { %517 = vmatpush.msra.mxu3 %v1582_v41 }
  0xe4   :  { %607 = vmatpush.msrb.mxu0 %v1491_v25  ;;  %627 = vmatpush.msrb.mxu1 %v1496_v26 }
  0xe5   :  { %518 = vmatpush.msra.mxu3 %v1601_v44 }
  0xe6   :  { %608 = vmatpush.msrb.mxu0 %v1510_v28  ;;  %628 = vmatpush.msrb.mxu1 %v1515_v29 }
  0xe7   :  { %519 = vmatpush.msra.mxu3 %v1624_v49 }
  0xe8   :  { %609 = vmatpush.msrb.mxu0 %v1529_v32  ;;  %629 = vmatpush.msrb.mxu1 %v1534_v33 }
  0xe9   :  { %520 = vmatpush.msra.mxu3 %v1636_v52 }
  0xea   :  { %610 = vmatpush.msrb.mxu0 %v1548_v35  ;;  %630 = vmatpush.msrb.mxu1 %v2422_v50 }
  0xeb   :  { %521 = vmatpush.msra.mxu3 %v1642_v53 }
  0xec   :  { %611 = vmatpush.msrb.mxu0 %v2423_v59  ;;  %631 = vmatpush.msrb.mxu1 %v2425_v62 }
  0xed   :  { %522 = vmatpush.msra.mxu3 %v2424_v60  ;;  %v321_v60 = vpop.permute.xlu1 %320 }
  0xee   :  { %612 = vmatpush.msrb.mxu0 %v2426_v30  ;;  %632 = vmatpush.msrb.mxu1 %v2428_v47 }
  0xef   :  { %523 = vmatpush.msra.mxu3 %v2427_v63 }
  0xf0   :  { %613 = vmatpush.msrb.mxu0 %v2429_v58  ;;  %633 = vmatpush.msrb.mxu1 %v2430_v6 }
 0x14d   :  { %v245_v43 = vpop.f32.mrf.mxu0 }
 0x14e   :  { %v288_v54 = vadd.f32 %v1131_v21, %v245_v43 }
 0x150   :  { %v1134_v45 = vmul.f32 -1.442695, %v288_v54 }
 0x152   :  { %1195 = vpow2.f32 %v1134_v45 }
 0x153   :  { %v225_v51 = vpop.f32.mrf.mxu3 }
 0x154   :  { %v268_v40 = vadd.f32 %v1130_v48, %v225_v51  ;;  %v265_v48 = vpop.f32.mrf.mxu1 }
 0x156   :  { %v1133_v42 = vmul.f32 -1.442695, %v268_v40 }
 0x158   :  { %v1196_v46 = vpop.eup %1195  ;;  %1197 = vpow2.f32 %v1133_v42  ;;  %v2431_v42 = vld [vmem:[#allocation12_spill] sm:$0xff] }
 0x159   :  { %v292_v56 = vadd.f32 1.0, %v1196_v46  ;;  %v308_v46 = vadd.f32 %v2431_v42, %v265_v48  ;;  %v330_v42 = vpop.permute.xlu1 %329 }
 0x15b   :  { %1199 = vrcp.f32 %v292_v56  ;;  %vm298_vm13 = vweird.f32 %v292_v56 }
 0x15e   :  { %v1198_v61 = vpop.eup %1197 }
 0x15f   :  { %v272_v37 = vadd.f32 1.0, %v1198_v61 }
 0x161   :  { %1201 = vrcp.f32 %v272_v37  ;;  %v1200_v39 = vpop.eup %1199  ;;  %v284_v6 = vand.u32 2147483648, %v272_v37  ;;  %v282_v45 = vand.u32 2147483647, %v272_v37  ;;  %vm278_vm9 = vweird.f32 %v272_v37 }
 0x162   :  { %v294_v55 = vmul.f32 %v1200_v39, %v292_v56  ;;  %vm299_vm12 = vweird.f32 %v1200_v39 }
 0x163   :  { %v285_v40 = vor.u32 1.1754944e-38, %v284_v6  ;;  %vm283_vm11 = vcmp.eq.f32.partialorder %v282_v45, 8.507059e+37  ;;  %vm300_vm14 = vmor %vm298_vm13, %vm299_vm12 }
 0x164   :  { %v295_v43 = vsub.f32 1.0, %v294_v55  ;;  %v1132_v55 = vld [vmem:[%s2389_s0 + $0x28] sm:$0xff] }
 0x166   :  { %v296_v63 = vmul.f32 %v1200_v39, %v295_v43  ;;  %v302_v43 = vand.u32 2147483647, %v292_v56 }
 0x167   :  { %v1202_v57 = vpop.eup %1201 }
 0x168   :  { %v274_v21 = vmul.f32 %v1202_v57, %v272_v37  ;;  %vm279_vm8 = vweird.f32 %v1202_v57  ;;  %v297_v47 = vadd.f32 %v1200_v39, %v296_v63  ;;  %vm303_vm15 = vcmp.eq.f32.partialorder %v302_v43, 8.507059e+37 }
 0x169   :  { %vm280_vm10 = vmor %vm278_vm9, %vm279_vm8 }
 0x16a   :  { %v275_v54 = vsub.f32 1.0, %v274_v21  ;;  %v301_v37 = vsel %vm300_vm14, %v1200_v39, %v297_v47 }
 0x16c   :  { %v276_v58 = vmul.f32 %v1202_v57, %v275_v54  ;;  %v304_v54 = vand.u32 2147483648, %v292_v56 }
 0x16e   :  { %v277_v51 = vadd.f32 %v1202_v57, %v276_v58  ;;  %v305_v6 = vor.u32 1.1754944e-38, %v304_v54 }
 0x170   :  { %v281_v61 = vsel %vm280_vm10, %v1202_v57, %v277_v51  ;;  %v306_v57 = vsel %vm303_vm15, %v305_v6, %v301_v37 }
 0x171   :  { %v286_v21 = vsel %vm283_vm11, %v285_v40, %v281_v61  ;;  %v312_v45 = vsub.f32 1.0, %v306_v57  ;;  %v314_v51 = vmul.f32 %v306_v57, %v1815_v36  ;;  %v332_v40 = vmul.f32 %v330_v42, %v1815_v36 }
 0x172   :  { %v309_v30 = vmul.f32 %v308_v46, %v286_v21 }
 0x174   :  { %v310_v58 = vadd.f32 %v1132_v55, %v309_v30  ;;  %v451_v55 = vpop.permute.xlu2 %450 }
 0x176   :  { %1203 = vtanh.f32 %v310_v58 }
 0x17c   :  { %v1204_v63 = vpop.eup %1203 }
 0x17d   :  { %v313_v48 = vmul.f32 %v1204_v63, %v312_v45  ;;  %v460_v63 = vpop.permute.xlu2 %459 }
 0x17f   :  { %v315_v62 = vadd.f32 %v314_v51, %v313_v48 }
 0x181   :  { %v323_v46 = vmul.f32 %v321_v60, %v315_v62  ;;  %v1139_v62 = vld [vmem:[%s2389_s0 + $0x40] sm:$0xff] }
 0x183   :  { %1136 = vst [vmem:[%s2390_s4 + $0x8] sm:$0xff] %v323_v46  ;;  %v1884_v30 = vadd.f32 %v332_v40, %v323_v46 }
 0x185   :  { %354 = vmatmul.f32.vlgmr.msrb.gmra.mxu2 %v1884_v30  ;;  %374 = vmatmul.f32.vlgmr.msrb.gmra.mxu3 %v1884_v30  ;;  %v462_v51 = vmul.f32 %v460_v63, %v1884_v30 }
 0x186   :  { %394 = vmatmul.f32.vlgmr.msra.gmra.mxu0 %v1884_v30  ;;  %638 = vmatpush.msrb.mxu2 %v1419_v13 }
 0x187   :  { %728 = vmatpush.msrb.mxu3 %v1349_v0  ;;  %748 = vmatpush.msra.mxu0 %v1354_v1  ;;  %v2432_v0 = vld [vmem:[#allocation5_spill] sm:$0xff]  ;;  %v2433_v1 = vld [vmem:[#allocation10_spill] sm:$0xff] }
 0x188   :  { %639 = vmatpush.msrb.mxu2 %v1427_v14 }
 0x189   :  { %729 = vmatpush.msrb.mxu3 %v1359_v2  ;;  %749 = vmatpush.msra.mxu0 %v1366_v3  ;;  %v2434_v2 = vld [vmem:[#allocation6_spill] sm:$0xff]  ;;  %v2435_v3 = vld [vmem:[#allocation7_spill] sm:$0xff] }
 0x18a   :  { %640 = vmatpush.msrb.mxu2 %v1446_v17 }
 0x18b   :  { %730 = vmatpush.msrb.mxu3 %v1371_v4  ;;  %750 = vmatpush.msra.mxu0 %v1376_v5  ;;  %v2436_v4 = vld [vmem:[#allocation11_spill] sm:$0xff]  ;;  %v2437_v5 = vld [vmem:[#allocation8_spill] sm:$0xff] }
 0x18c   :  { %641 = vmatpush.msrb.mxu2 %v1465_v20 }
 0x18d   :  { %731 = vmatpush.msrb.mxu3 %v1383_v7  ;;  %751 = vmatpush.msra.mxu0 %v1388_v8  ;;  %v2438_v7 = vld [vmem:[#allocation9_spill] sm:$0xff] }
 0x18e   :  { %642 = vmatpush.msrb.mxu2 %v1486_v24  ;;  %v1137_v8 = vld [vmem:[%s2389_s0 + $0x30] sm:$0xff] }
 0x18f   :  { %732 = vmatpush.msrb.mxu3 %v1396_v9  ;;  %752 = vmatpush.msra.mxu0 %v1401_v10  ;;  %v1138_v9 = vld [vmem:[%s2389_s0 + $0x38] sm:$0xff] }
 0x190   :  { %643 = vmatpush.msrb.mxu2 %v1505_v27 }
 0x191   :  { %733 = vmatpush.msrb.mxu3 %v1409_v11  ;;  %753 = vmatpush.msra.mxu0 %v1414_v12 }
 0x192   :  { %644 = vmatpush.msrb.mxu2 %v1524_v31 }
 0x193   :  { %734 = vmatpush.msrb.mxu3 %v1432_v15  ;;  %754 = vmatpush.msra.mxu0 %v1437_v16 }
 0x194   :  { %645 = vmatpush.msrb.mxu2 %v1543_v34 }
 0x195   :  { %735 = vmatpush.msrb.mxu3 %v1451_v18  ;;  %755 = vmatpush.msra.mxu0 %v1456_v19 }
 0x196   :  { %646 = vmatpush.msrb.mxu2 %v1564_v38 }
 0x197   :  { %736 = vmatpush.msrb.mxu3 %v1473_v22  ;;  %756 = vmatpush.msra.mxu0 %v1478_v23 }
 0x198   :  { %647 = vmatpush.msrb.mxu2 %v1582_v41 }
 0x199   :  { %737 = vmatpush.msrb.mxu3 %v1491_v25  ;;  %757 = vmatpush.msra.mxu0 %v1496_v26 }
 0x19a   :  { %648 = vmatpush.msrb.mxu2 %v1601_v44 }
 0x19b   :  { %738 = vmatpush.msrb.mxu3 %v1510_v28  ;;  %758 = vmatpush.msra.mxu0 %v1515_v29 }
 0x19c   :  { %649 = vmatpush.msrb.mxu2 %v1624_v49 }
 0x19d   :  { %739 = vmatpush.msrb.mxu3 %v1529_v32  ;;  %759 = vmatpush.msra.mxu0 %v1534_v33 }
 0x19e   :  { %650 = vmatpush.msrb.mxu2 %v1636_v52 }
 0x19f   :  { %740 = vmatpush.msrb.mxu3 %v1548_v35  ;;  %760 = vmatpush.msra.mxu0 %v2422_v50  ;;  %v2439_v50 = vld [vmem:[#allocation12_spill] sm:$0xff] }
 0x1a0   :  { %651 = vmatpush.msrb.mxu2 %v1642_v53 }
 0x1a1   :  { %741 = vmatpush.msrb.mxu3 %v2423_v59  ;;  %761 = vmatpush.msra.mxu0 %v2432_v0  ;;  %v1960_v0 = vld [vmem:[%s2386_s2 + $0x178] sm:$0xff] }
 0x1a2   :  { %652 = vmatpush.msrb.mxu2 %v2433_v1 }
 0x1a3   :  { %742 = vmatpush.msrb.mxu3 %v2434_v2  ;;  %762 = vmatpush.msra.mxu0 %v2435_v3 }
 0x1a4   :  { %653 = vmatpush.msrb.mxu2 %v2436_v4 }
 0x1a5   :  { %743 = vmatpush.msrb.mxu3 %v2437_v5  ;;  %763 = vmatpush.msra.mxu0 %v2438_v7 }
 0x203   :  { %v395_v32 = vpop.f32.mrf.mxu0 }
 0x204   :  { %v438_v59 = vadd.f32 %v2439_v50, %v395_v32  ;;  %v2127_v32 = vld [vmem:[%s2386_s2 + $0x80] sm:$0xff] }
 0x208   :  { %v355_v10 = vpop.f32.mrf.mxu2  ;;  %v375_v11 = vpop.f32.mrf.mxu3 }
 0x209   :  { %v398_v12 = vadd.f32 %v1137_v8, %v355_v10  ;;  %v418_v13 = vadd.f32 %v1138_v9, %v375_v11  ;;  %v1972_v8 = vld [vmem:[%s2386_s2 + $0x170] sm:$0xff]  ;;  %v1978_v9 = vld [vmem:[%s2386_s2 + $0x160] sm:$0xff]  ;;  %v1990_v11 = vld [vmem:[%s2386_s2 + $0x158] sm:$0xff] }
 0x20a   :  { %v1984_v10 = vld [vmem:[%s2386_s2 + $0x150] sm:$0xff] }
 0x20b   :  { %v1140_v14 = vmul.f32 -1.442695, %v398_v12  ;;  %v1141_v15 = vmul.f32 -1.442695, %v418_v13  ;;  %v1996_v12 = vld [vmem:[%s2386_s2 + $0x148] sm:$0xff]  ;;  %v2002_v13 = vld [vmem:[%s2386_s2 + $0x138] sm:$0xff] }
 0x20d   :  { %1205 = vpow2.f32 %v1140_v14  ;;  %v2008_v14 = vld [vmem:[%s2386_s2 + $0x140] sm:$0xff] }
 0x20e   :  { %1207 = vpow2.f32 %v1141_v15  ;;  %v2014_v15 = vld [vmem:[%s2386_s2 + $0x130] sm:$0xff] }
 0x213   :  { %v1206_v16 = vpop.eup %1205 }
 0x214   :  { %v1208_v17 = vpop.eup %1207  ;;  %v402_v18 = vadd.f32 1.0, %v1206_v16  ;;  %v2020_v16 = vld [vmem:[%s2386_s2 + $0x120] sm:$0xff] }
 0x215   :  { %v422_v19 = vadd.f32 1.0, %v1208_v17  ;;  %v2026_v17 = vld [vmem:[%s2386_s2 + $0x128] sm:$0xff] }
 0x216   :  { %1209 = vrcp.f32 %v402_v18  ;;  %v414_v26 = vand.u32 2147483648, %v402_v18  ;;  %v412_v29 = vand.u32 2147483647, %v402_v18  ;;  %vm408_vm1 = vweird.f32 %v402_v18 }
 0x217   :  { %1211 = vrcp.f32 %v422_v19  ;;  %v434_v42 = vand.u32 2147483648, %v422_v19  ;;  %vm428_vm5 = vweird.f32 %v422_v19  ;;  %v432_v61 = vand.u32 2147483647, %v422_v19 }
 0x218   :  { %v415_v36 = vor.u32 1.1754944e-38, %v414_v26  ;;  %vm413_vm3 = vcmp.eq.f32.partialorder %v412_v29, 8.507059e+37  ;;  %v2075_v26 = vld [vmem:[%s2386_s2 + $0xe0] sm:$0xff]  ;;  %v2114_v29 = vld [vmem:[%s2386_s2 + $0x98] sm:$0xff] }
 0x219   :  { %v435_v43 = vor.u32 1.1754944e-38, %v434_v42  ;;  %vm433_vm7 = vcmp.eq.f32.partialorder %v432_v61, 8.507059e+37 }
 0x21c   :  { %v1210_v20 = vpop.eup %1209 }
 0x21d   :  { %v1212_v22 = vpop.eup %1211  ;;  %v404_v23 = vmul.f32 %v1210_v20, %v402_v18  ;;  %vm409_vm0 = vweird.f32 %v1210_v20  ;;  %v2032_v18 = vld [vmem:[%s2386_s2 + $0x118] sm:$0xff] }
 0x21e   :  { %v424_v24 = vmul.f32 %v1212_v22, %v422_v19  ;;  %vm410_vm2 = vmor %vm408_vm1, %vm409_vm0  ;;  %vm429_vm4 = vweird.f32 %v1212_v22  ;;  %v2038_v19 = vld [vmem:[%s2386_s2 + $0x108] sm:$0xff] }
 0x21f   :  { %v405_v25 = vsub.f32 1.0, %v404_v23  ;;  %vm430_vm6 = vmor %vm428_vm5, %vm429_vm4  ;;  %v2056_v23 = vld [vmem:[%s2386_s2 + $0xf0] sm:$0xff] }
 0x220   :  { %v425_v27 = vsub.f32 1.0, %v424_v24  ;;  %v2062_v24 = vld [vmem:[%s2386_s2 + $0xf8] sm:$0xff] }
 0x221   :  { %v406_v28 = vmul.f32 %v1210_v20, %v405_v25  ;;  %v2069_v25 = vld [vmem:[%s2386_s2 + $0xd8] sm:$0xff] }
 0x222   :  { %v426_v33 = vmul.f32 %v1212_v22, %v425_v27  ;;  %v2088_v27 = vld [vmem:[%s2386_s2 + $0xc8] sm:$0xff] }
 0x223   :  { %v407_v35 = vadd.f32 %v1210_v20, %v406_v28  ;;  %v2101_v28 = vld [vmem:[%s2386_s2 + $0xb0] sm:$0xff] }
 0x224   :  { %v427_v56 = vadd.f32 %v1212_v22, %v426_v33  ;;  %v2140_v33 = vld [vmem:[%s2386_s2 + $0x68] sm:$0xff] }
 0x225   :  { %v411_v60 = vsel %vm410_vm2, %v1210_v20, %v407_v35  ;;  %v2044_v20 = vld [vmem:[%s2386_s2 + $0x110] sm:$0xff] }
 0x226   :  { %v416_v47 = vsel %vm413_vm3, %v415_v36, %v411_v60  ;;  %v431_v54 = vsel %vm430_vm6, %v1212_v22, %v427_v56  ;;  %v2050_v22 = vld [vmem:[%s2386_s2 + $0x100] sm:$0xff]  ;;  %v2153_v35 = vld [vmem:[%s2386_s2 + $0x50] sm:$0xff]  ;;  %v2166_v36 = vld [vmem:[%s2386_s2 + $0x38] sm:$0xff] }
 0x227   :  { %v439_v39 = vmul.f32 %v438_v59, %v416_v47  ;;  %v436_v58 = vsel %vm433_vm7, %v435_v43, %v431_v54 }
 0x228   :  { %v442_v37 = vsub.f32 1.0, %v436_v58  ;;  %v444_v45 = vmul.f32 %v436_v58, %v1884_v30  ;;  %v1966_v30 = vld [vmem:[%s2386_s2 + $0x168] sm:$0xff] }
 0x229   :  { %v440_v21 = vadd.f32 %v1139_v62, %v439_v39 }
 0x22b   :  { %1213 = vtanh.f32 %v440_v21 }
 0x231   :  { %v1214_v6 = vpop.eup %1213 }
 0x232   :  { %v443_v57 = vmul.f32 %v1214_v6, %v442_v37 }
 0x234   :  { %v445_v48 = vadd.f32 %v444_v45, %v443_v57 }
 0x236   :  { %v453_v40 = vmul.f32 %v451_v55, %v445_v48 }
 0x238   :  { %1143 = vst [vmem:[%s2390_s4 + $0x10] sm:$0xff] %v453_v40  ;;  %v1952_v46 = vadd.f32 %v462_v51, %v453_v40  ;;  %v1146_v51 = vld [vmem:[%s2389_s0 + $0x58] sm:$0xff] }
 0x23a   :  { %484 = vmatmul.f32.vlgmr.msra.gmra.mxu1 %v1952_v46  ;;  %504 = vmatmul.f32.vlgmr.msra.gmra.mxu2 %v1952_v46 }
 0x23b   :  { %524 = vmatmul.f32.vlgmr.msra.gmra.mxu3 %v1952_v46  ;;  %768 = vmatpush.msra.mxu1 %v1960_v0 }
 0x23c   :  { %858 = vmatpush.msra.mxu2 %v1966_v30  ;;  %878 = vmatpush.msra.mxu3 %v1972_v8 }
 0x23d   :  { %769 = vmatpush.msra.mxu1 %v1978_v9 }
 0x23e   :  { %859 = vmatpush.msra.mxu2 %v1984_v10  ;;  %879 = vmatpush.msra.mxu3 %v1990_v11 }
 0x23f   :  { %770 = vmatpush.msra.mxu1 %v1996_v12 }
 0x240   :  { %860 = vmatpush.msra.mxu2 %v2002_v13  ;;  %880 = vmatpush.msra.mxu3 %v2008_v14 }
 0x241   :  { %771 = vmatpush.msra.mxu1 %v2014_v15 }
 0x242   :  { %861 = vmatpush.msra.mxu2 %v2020_v16  ;;  %881 = vmatpush.msra.mxu3 %v2026_v17 }
 0x243   :  { %772 = vmatpush.msra.mxu1 %v2032_v18 }
 0x244   :  { %862 = vmatpush.msra.mxu2 %v2038_v19  ;;  %882 = vmatpush.msra.mxu3 %v2044_v20 }
 0x245   :  { %773 = vmatpush.msra.mxu1 %v2050_v22 }
 0x246   :  { %863 = vmatpush.msra.mxu2 %v2056_v23  ;;  %883 = vmatpush.msra.mxu3 %v2062_v24 }
 0x247   :  { %774 = vmatpush.msra.mxu1 %v1524_v31  ;;  %v2082_v31 = vld [vmem:[%s2386_s2 + $0xc0] sm:$0xff] }
 0x248   :  { %864 = vmatpush.msra.mxu2 %v2069_v25  ;;  %884 = vmatpush.msra.mxu3 %v2075_v26 }
 0x249   :  { %775 = vmatpush.msra.mxu1 %v1543_v34  ;;  %v2095_v34 = vld [vmem:[%s2386_s2 + $0xa8] sm:$0xff] }
 0x24a   :  { %865 = vmatpush.msra.mxu2 %v2082_v31  ;;  %885 = vmatpush.msra.mxu3 %v2088_v27 }
 0x24b   :  { %776 = vmatpush.msra.mxu1 %v1564_v38  ;;  %v2108_v38 = vld [vmem:[%s2386_s2 + $0x90] sm:$0xff] }
 0x24c   :  { %866 = vmatpush.msra.mxu2 %v2095_v34  ;;  %886 = vmatpush.msra.mxu3 %v2101_v28 }
 0x24d   :  { %777 = vmatpush.msra.mxu1 %v1582_v41  ;;  %v2121_v41 = vld [vmem:[%s2386_s2 + $0x78] sm:$0xff] }
 0x24e   :  { %867 = vmatpush.msra.mxu2 %v2108_v38  ;;  %887 = vmatpush.msra.mxu3 %v2114_v29 }
 0x24f   :  { %778 = vmatpush.msra.mxu1 %v1601_v44  ;;  %v2134_v44 = vld [vmem:[%s2386_s2 + $0x60] sm:$0xff] }
 0x250   :  { %868 = vmatpush.msra.mxu2 %v2121_v41  ;;  %888 = vmatpush.msra.mxu3 %v2127_v32 }
 0x251   :  { %779 = vmatpush.msra.mxu1 %v1624_v49  ;;  %v2147_v49 = vld [vmem:[%s2386_s2 + $0x48] sm:$0xff] }
 0x252   :  { %869 = vmatpush.msra.mxu2 %v2134_v44  ;;  %889 = vmatpush.msra.mxu3 %v2140_v33 }
 0x253   :  { %780 = vmatpush.msra.mxu1 %v1636_v52  ;;  %v2160_v52 = vld [vmem:[%s2386_s2 + $0x30] sm:$0xff] }
 0x254   :  { %870 = vmatpush.msra.mxu2 %v2147_v49  ;;  %890 = vmatpush.msra.mxu3 %v2153_v35 }
 0x255   :  { %781 = vmatpush.msra.mxu1 %v1642_v53  ;;  %v1144_v53 = vld [vmem:[%s2389_s0 + $0x48] sm:$0xff] }
 0x256   :  { %871 = vmatpush.msra.mxu2 %v2160_v52  ;;  %891 = vmatpush.msra.mxu3 %v2166_v36 }
 0x257   :  { %782 = vmatpush.msra.mxu1 %v2433_v1  ;;  %v1145_v1 = vld [vmem:[%s2389_s0 + $0x50] sm:$0xff] }
 0x258   :  { %872 = vmatpush.msra.mxu2 %v2434_v2  ;;  %892 = vmatpush.msra.mxu3 %v2435_v3 }
 0x259   :  { %783 = vmatpush.msra.mxu1 %v2436_v4 }
 0x25a   :  { %873 = vmatpush.msra.mxu2 %v2437_v5  ;;  %893 = vmatpush.msra.mxu3 %v2438_v7 }
 0x2b7   :  { %v485_v59 = vpop.f32.mrf.mxu1 }
 0x2b8   :  { %v528_v60 = vadd.f32 %v1144_v53, %v485_v59 }
 0x2ba   :  { %v1147_v62 = vmul.f32 -1.442695, %v528_v60 }
 0x2bc   :  { %1215 = vpow2.f32 %v1147_v62 }
 0x2bd   :  { %v505_v2 = vpop.f32.mrf.mxu2 }
 0x2be   :  { %v548_v3 = vadd.f32 %v1145_v1, %v505_v2  ;;  %v525_v58 = vpop.f32.mrf.mxu3 }
 0x2bf   :  { %v568_v48 = vadd.f32 %v2439_v50, %v525_v58 }
 0x2c0   :  { %v1148_v47 = vmul.f32 -1.442695, %v548_v3 }
 0x2c2   :  { %v1216_v4 = vpop.eup %1215  ;;  %1217 = vpow2.f32 %v1148_v47 }
 0x2c3   :  { %v532_v5 = vadd.f32 1.0, %v1216_v4 }
 0x2c5   :  { %1219 = vrcp.f32 %v532_v5  ;;  %v544_v55 = vand.u32 2147483648, %v532_v5  ;;  %v542_v54 = vand.u32 2147483647, %v532_v5  ;;  %vm538_vm9 = vweird.f32 %v532_v5 }
 0x2c7   :  { %v545_v57 = vor.u32 1.1754944e-38, %v544_v55  ;;  %vm543_vm11 = vcmp.eq.f32.partialorder %v542_v54, 8.507059e+37  ;;  %v581_v55 = vpop.permute.xlu0 %580 }
 0x2c8   :  { %v1218_v7 = vpop.eup %1217 }
 0x2c9   :  { %v552_v56 = vadd.f32 1.0, %v1218_v7 }
 0x2cb   :  { %v1220_v39 = vpop.eup %1219  ;;  %1221 = vrcp.f32 %v552_v56  ;;  %v564_v59 = vand.u32 2147483648, %v552_v56  ;;  %v562_v62 = vand.u32 2147483647, %v552_v56  ;;  %vm558_vm13 = vweird.f32 %v552_v56 }
 0x2cc   :  { %v534_v42 = vmul.f32 %v1220_v39, %v532_v5  ;;  %vm539_vm8 = vweird.f32 %v1220_v39 }
 0x2cd   :  { %vm540_vm10 = vmor %vm538_vm9, %vm539_vm8  ;;  %v565_v3 = vor.u32 1.1754944e-38, %v564_v59  ;;  %vm563_vm15 = vcmp.eq.f32.partialorder %v562_v62, 8.507059e+37 }
 0x2ce   :  { %v535_v61 = vsub.f32 1.0, %v534_v42 }
 0x2d0   :  { %v536_v21 = vmul.f32 %v1220_v39, %v535_v61 }
 0x2d1   :  { %v1222_v43 = vpop.eup %1221 }
 0x2d2   :  { %v554_v37 = vmul.f32 %v1222_v43, %v552_v56  ;;  %v537_v6 = vadd.f32 %v1220_v39, %v536_v21  ;;  %vm559_vm12 = vweird.f32 %v1222_v43  ;;  %v590_v21 = vpop.permute.xlu1 %589 }
 0x2d3   :  { %vm560_vm14 = vmor %vm558_vm13, %vm559_vm12  ;;  %v592_v58 = vmul.f32 %v590_v21, %v1952_v46 }
 0x2d4   :  { %v555_v45 = vsub.f32 1.0, %v554_v37  ;;  %v541_v63 = vsel %vm540_vm10, %v1220_v39, %v537_v6 }
 0x2d5   :  { %v546_v40 = vsel %vm543_vm11, %v545_v57, %v541_v63 }
 0x2d6   :  { %v556_v53 = vmul.f32 %v1222_v43, %v555_v45  ;;  %v569_v60 = vmul.f32 %v568_v48, %v546_v40 }
 0x2d8   :  { %v557_v1 = vadd.f32 %v1222_v43, %v556_v53  ;;  %v570_v2 = vadd.f32 %v1146_v51, %v569_v60 }
 0x2da   :  { %v561_v47 = vsel %vm560_vm14, %v1222_v43, %v557_v1  ;;  %1223 = vtanh.f32 %v570_v2  ;;  %v1153_v1 = vld [vmem:[%s2389_s0 + $0x70] sm:$0xff] }
 0x2db   :  { %v566_v4 = vsel %vm563_vm15, %v565_v3, %v561_v47 }
 0x2dc   :  { %v572_v5 = vsub.f32 1.0, %v566_v4  ;;  %v574_v42 = vmul.f32 %v566_v4, %v1952_v46  ;;  %v2216_v46 = vld [vmem:[%s2386_s2 + $0xe8] sm:$0xff] }
 0x2e0   :  { %v1224_v7 = vpop.eup %1223 }
 0x2e1   :  { %v573_v39 = vmul.f32 %v1224_v7, %v572_v5 }
 0x2e3   :  { %v575_v61 = vadd.f32 %v574_v42, %v573_v39 }
 0x2e5   :  { %v583_v54 = vmul.f32 %v581_v55, %v575_v61 }
 0x2e7   :  { %1150 = vst [vmem:[%s2390_s4 + $0x18] sm:$0xff] %v583_v54  ;;  %v2190_v56 = vadd.f32 %v592_v58, %v583_v54  ;;  %v720_v58 = vpop.permute.xlu0 %719 }
 0x2e9   :  { %614 = vmatmul.f32.vlgmr.msrb.gmra.mxu0 %v2190_v56  ;;  %634 = vmatmul.f32.vlgmr.msrb.gmra.mxu1 %v2190_v56 }
 0x2ea   :  { %654 = vmatmul.f32.vlgmr.msrb.gmra.mxu2 %v2190_v56  ;;  %898 = vmatpush.msrb.mxu0 %v1960_v0 }
 0x2eb   :  { %988 = vmatpush.msrb.mxu1 %v1966_v30  ;;  %1008 = vmatpush.msrb.mxu2 %v1972_v8  ;;  %v2224_v30 = vld [vmem:[%s2386_s2 + $0xd0] sm:$0xff]  ;;  %v2232_v8 = vld [vmem:[%s2386_s2 + $0xb8] sm:$0xff] }
 0x2ec   :  { %899 = vmatpush.msrb.mxu0 %v1978_v9 }
 0x2ed   :  { %989 = vmatpush.msrb.mxu1 %v1984_v10  ;;  %1009 = vmatpush.msrb.mxu2 %v1990_v11  ;;  %v2240_v10 = vld [vmem:[%s2386_s2 + $0xa0] sm:$0xff]  ;;  %v2248_v11 = vld [vmem:[%s2386_s2 + $0x88] sm:$0xff] }
 0x2ee   :  { %900 = vmatpush.msrb.mxu0 %v1996_v12 }
 0x2ef   :  { %990 = vmatpush.msrb.mxu1 %v2002_v13  ;;  %1010 = vmatpush.msrb.mxu2 %v2008_v14  ;;  %v2256_v13 = vld [vmem:[%s2386_s2 + $0x70] sm:$0xff]  ;;  %v2264_v14 = vld [vmem:[%s2386_s2 + $0x58] sm:$0xff] }
 0x2f0   :  { %901 = vmatpush.msrb.mxu0 %v2014_v15 }
 0x2f1   :  { %991 = vmatpush.msrb.mxu1 %v2020_v16  ;;  %1011 = vmatpush.msrb.mxu2 %v2026_v17  ;;  %v2272_v16 = vld [vmem:[%s2386_s2 + $0x40] sm:$0xff]  ;;  %v2280_v17 = vld [vmem:[%s2386_s2 + $0x28] sm:$0xff] }
 0x2f2   :  { %902 = vmatpush.msrb.mxu0 %v2032_v18 }
 0x2f3   :  { %992 = vmatpush.msrb.mxu1 %v2038_v19  ;;  %1012 = vmatpush.msrb.mxu2 %v2044_v20  ;;  %v1308_v19 = vld [vmem:[%s2386_s2 + $0x18] sm:$0xff]  ;;  %v1309_v20 = vld [vmem:[%s2386_s2 + $0x20] sm:$0xff] }
 0x2f4   :  { %903 = vmatpush.msrb.mxu0 %v2050_v22 }
 0x2f5   :  { %993 = vmatpush.msrb.mxu1 %v2056_v23  ;;  %1013 = vmatpush.msrb.mxu2 %v2062_v24  ;;  %v2292_v23 = vld [vmem:[%s2386_s2 + $0x10] sm:$0xff]  ;;  %v1311_v24 = vld [vmem:[%s2386_s2] sm:$0xff] }
 0x2f6   :  { %904 = vmatpush.msrb.mxu0 %v2216_v46 }
 0x2f7   :  { %994 = vmatpush.msrb.mxu1 %v2069_v25  ;;  %1014 = vmatpush.msrb.mxu2 %v2075_v26  ;;  %v1312_v25 = vld [vmem:[%s2386_s2 + $0x8] sm:$0xff]  ;;  %v1151_v26 = vld [vmem:[%s2389_s0 + $0x60] sm:$0xff] }
 0x2f8   :  { %905 = vmatpush.msrb.mxu0 %v2224_v30 }
 0x2f9   :  { %995 = vmatpush.msrb.mxu1 %v2082_v31  ;;  %1015 = vmatpush.msrb.mxu2 %v2088_v27  ;;  %v1152_v31 = vld [vmem:[%s2389_s0 + $0x68] sm:$0xff] }
 0x2fa   :  { %906 = vmatpush.msrb.mxu0 %v2232_v8 }
 0x2fb   :  { %996 = vmatpush.msrb.mxu1 %v2095_v34  ;;  %1016 = vmatpush.msrb.mxu2 %v2101_v28 }
 0x2fc   :  { %907 = vmatpush.msrb.mxu0 %v2240_v10 }
 0x2fd   :  { %997 = vmatpush.msrb.mxu1 %v2108_v38  ;;  %1017 = vmatpush.msrb.mxu2 %v2114_v29 }
 0x2fe   :  { %908 = vmatpush.msrb.mxu0 %v2248_v11 }
 0x2ff   :  { %998 = vmatpush.msrb.mxu1 %v2121_v41  ;;  %1018 = vmatpush.msrb.mxu2 %v2127_v32 }
 0x300   :  { %909 = vmatpush.msrb.mxu0 %v2256_v13 }
 0x301   :  { %999 = vmatpush.msrb.mxu1 %v2134_v44  ;;  %1019 = vmatpush.msrb.mxu2 %v2140_v33 }
 0x302   :  { %910 = vmatpush.msrb.mxu0 %v2264_v14 }
 0x303   :  { %1000 = vmatpush.msrb.mxu1 %v2147_v49  ;;  %1020 = vmatpush.msrb.mxu2 %v2153_v35 }
 0x304   :  { %911 = vmatpush.msrb.mxu0 %v2272_v16 }
 0x305   :  { %1001 = vmatpush.msrb.mxu1 %v2160_v52  ;;  %1021 = vmatpush.msrb.mxu2 %v2166_v36 }
 0x306   :  { %912 = vmatpush.msrb.mxu0 %v2280_v17 }
 0x307   :  { %1002 = vmatpush.msrb.mxu1 %v1308_v19  ;;  %1022 = vmatpush.msrb.mxu2 %v1309_v20  ;;  %v711_v19 = vpop.permute.xlu2 %710 }
 0x308   :  { %913 = vmatpush.msrb.mxu0 %v2292_v23 }
 0x309   :  { %1003 = vmatpush.msrb.mxu1 %v1311_v24  ;;  %1023 = vmatpush.msrb.mxu2 %v1312_v25  ;;  %v722_v24 = vmul.f32 %v720_v58, %v2190_v56 }
 0x366   :  { %v615_v27 = vpop.f32.mrf.mxu0  ;;  %v635_v34 = vpop.f32.mrf.mxu1 }
 0x367   :  { %v658_v28 = vadd.f32 %v1151_v26, %v615_v27  ;;  %v678_v38 = vadd.f32 %v1152_v31, %v635_v34 }
 0x369   :  { %v1154_v29 = vmul.f32 -1.442695, %v658_v28  ;;  %v1155_v41 = vmul.f32 -1.442695, %v678_v38 }
 0x36b   :  { %1225 = vpow2.f32 %v1154_v29 }
 0x36c   :  { %1227 = vpow2.f32 %v1155_v41 }
 0x36d   :  { %v655_v51 = vpop.f32.mrf.mxu2 }
 0x36e   :  { %v698_v60 = vadd.f32 %v2439_v50, %v655_v51 }
 0x371   :  { %v1226_v32 = vpop.eup %1225 }
 0x372   :  { %v1228_v44 = vpop.eup %1227  ;;  %v662_v33 = vadd.f32 1.0, %v1226_v32  ;;  %v2346_v32 = vld [vmem:[%s2388_s3] ss:$0 sm:$0xff] }
 0x373   :  { %v682_v49 = vadd.f32 1.0, %v1228_v44 }
 0x374   :  { %1229 = vrcp.f32 %v662_v33  ;;  %v674_v57 = vand.u32 2147483648, %v662_v33  ;;  %v672_v63 = vand.u32 2147483647, %v662_v33  ;;  %vm668_vm1 = vweird.f32 %v662_v33 }
 0x375   :  { %1231 = vrcp.f32 %v682_v49  ;;  %v694_v3 = vand.u32 2147483648, %v682_v49  ;;  %vm688_vm5 = vweird.f32 %v682_v49  ;;  %v692_v4 = vand.u32 2147483647, %v682_v49 }
 0x376   :  { %v675_v53 = vor.u32 1.1754944e-38, %v674_v57  ;;  %vm673_vm3 = vcmp.eq.f32.partialorder %v672_v63, 8.507059e+37 }
 0x377   :  { %v695_v39 = vor.u32 1.1754944e-38, %v694_v3  ;;  %vm693_vm7 = vcmp.eq.f32.partialorder %v692_v4, 8.507059e+37  ;;  %v1166_v4 = vld [vmem:[%s2389_s0 + $0x98] sm:$0xff] }
 0x37a   :  { %v1230_v35 = vpop.eup %1229 }
 0x37b   :  { %v1232_v52 = vpop.eup %1231  ;;  %v664_v36 = vmul.f32 %v1230_v35, %v662_v33  ;;  %vm669_vm0 = vweird.f32 %v1230_v35 }
 0x37c   :  { %v684_v43 = vmul.f32 %v1232_v52, %v682_v49  ;;  %vm670_vm2 = vmor %vm668_vm1, %vm669_vm0  ;;  %vm689_vm4 = vweird.f32 %v1232_v52 }
 0x37d   :  { %v665_v37 = vsub.f32 1.0, %v664_v36  ;;  %vm690_vm6 = vmor %vm688_vm5, %vm689_vm4 }
 0x37e   :  { %v685_v6 = vsub.f32 1.0, %v684_v43 }
 0x37f   :  { %v666_v45 = vmul.f32 %v1230_v35, %v665_v37 }
 0x380   :  { %v686_v48 = vmul.f32 %v1232_v52, %v685_v6 }
 0x381   :  { %v667_v40 = vadd.f32 %v1230_v35, %v666_v45 }
 0x382   :  { %v687_v62 = vadd.f32 %v1232_v52, %v686_v48 }
 0x383   :  { %v671_v59 = vsel %vm670_vm2, %v1230_v35, %v667_v40  ;;  %v1160_v35 = vld [vmem:[%s2389_s0 + $0x88] sm:$0xff] }
 0x384   :  { %v676_v2 = vsel %vm673_vm3, %v675_v53, %v671_v59  ;;  %v691_v7 = vsel %vm690_vm6, %v1232_v52, %v687_v62  ;;  %v850_v62 = vpop.permute.xlu2 %849 }
 0x385   :  { %v699_v47 = vmul.f32 %v698_v60, %v676_v2  ;;  %v696_v42 = vsel %vm693_vm7, %v695_v39, %v691_v7  ;;  %v841_v60 = vpop.permute.xlu1 %840 }
 0x386   :  { %v702_v61 = vsub.f32 1.0, %v696_v42  ;;  %v704_v21 = vmul.f32 %v696_v42, %v2190_v56 }
 0x387   :  { %v700_v5 = vadd.f32 %v1153_v1, %v699_v47  ;;  %v1165_v47 = vld [vmem:[%s2389_s0 + $0x90] sm:$0xff] }
 0x389   :  { %1233 = vtanh.f32 %v700_v5 }
 0x38f   :  { %v1234_v50 = vpop.eup %1233 }
 0x390   :  { %v703_v55 = vmul.f32 %v1234_v50, %v702_v61 }
 0x392   :  { %v705_v54 = vadd.f32 %v704_v21, %v703_v55 }
 0x394   :  { %v713_v20 = vmul.f32 %v711_v19, %v705_v54 }
 0x396   :  { %1157 = vst [vmem:[%s2390_s4 + $0x20] sm:$0xff] %v713_v20  ;;  %v2316_v25 = vadd.f32 %v722_v24, %v713_v20 }
 0x398   :  { %744 = vmatmul.f32.vlgmr.msrb.gmra.mxu3 %v2316_v25  ;;  %764 = vmatmul.f32.vlgmr.msra.gmra.mxu0 %v2316_v25  ;;  %v852_v2 = vmul.f32 %v850_v62, %v2316_v25 }
 0x399   :  { %784 = vmatmul.f32.vlgmr.msra.gmra.mxu1 %v2316_v25  ;;  %1028 = vmatpush.msrb.mxu3 %v1960_v0  ;;  %v1159_v0 = vld [vmem:[%s2389_s0 + $0x80] sm:$0xff] }
 0x39b   :  { %1029 = vmatpush.msrb.mxu3 %v1978_v9 }
 0x39d   :  { %1030 = vmatpush.msrb.mxu3 %v1996_v12 }
 0x39f   :  { %1031 = vmatpush.msrb.mxu3 %v2014_v15 }
 0x3a1   :  { %1032 = vmatpush.msrb.mxu3 %v2032_v18  ;;  %v1158_v18 = vld [vmem:[%s2389_s0 + $0x78] sm:$0xff] }
 0x3a3   :  { %1033 = vmatpush.msrb.mxu3 %v2050_v22 }
 0x3a5   :  { %1034 = vmatpush.msrb.mxu3 %v2216_v46 }
 0x3a7   :  { %1035 = vmatpush.msrb.mxu3 %v2224_v30 }
 0x3a9   :  { %1036 = vmatpush.msrb.mxu3 %v2232_v8 }
 0x3ab   :  { %1037 = vmatpush.msrb.mxu3 %v2240_v10 }
 0x3ad   :  { %1038 = vmatpush.msrb.mxu3 %v2248_v11 }
 0x3af   :  { %1039 = vmatpush.msrb.mxu3 %v2256_v13 }
 0x3b1   :  { %1040 = vmatpush.msrb.mxu3 %v2264_v14 }
 0x3b3   :  { %1041 = vmatpush.msrb.mxu3 %v2272_v16 }
 0x3b5   :  { %1042 = vmatpush.msrb.mxu3 %v2280_v17 }
 0x3b7   :  { %1043 = vmatpush.msrb.mxu3 %v2292_v23 }
 0x415   :  { %v765_v9 = vpop.f32.mrf.mxu0 }
 0x416   :  { %v808_v12 = vadd.f32 %v1159_v0, %v765_v9  ;;  %v785_v38 = vpop.f32.mrf.mxu1 }
 0x417   :  { %v828_v44 = vadd.f32 %v2346_v32, %v785_v38 }
 0x418   :  { %v1162_v15 = vmul.f32 -1.442695, %v808_v12 }
 0x41a   :  { %1235 = vpow2.f32 %v1162_v15 }
 0x41b   :  { %v745_v22 = vpop.f32.mrf.mxu3 }
 0x41c   :  { %v788_v56 = vadd.f32 %v1158_v18, %v745_v22 }
 0x41e   :  { %v1161_v46 = vmul.f32 -1.442695, %v788_v56 }
 0x420   :  { %v1236_v30 = vpop.eup %1235  ;;  %1237 = vpow2.f32 %v1161_v46 }
 0x421   :  { %v812_v8 = vadd.f32 1.0, %v1236_v30 }
 0x423   :  { %1239 = vrcp.f32 %v812_v8  ;;  %v824_v36 = vand.u32 2147483648, %v812_v8  ;;  %vm818_vm13 = vweird.f32 %v812_v8  ;;  %v822_v37 = vand.u32 2147483647, %v812_v8 }
 0x425   :  { %v825_v45 = vor.u32 1.1754944e-38, %v824_v36  ;;  %vm823_vm15 = vcmp.eq.f32.partialorder %v822_v37, 8.507059e+37 }
 0x426   :  { %v1238_v10 = vpop.eup %1237 }
 0x427   :  { %v792_v11 = vadd.f32 1.0, %v1238_v10 }
 0x429   :  { %1241 = vrcp.f32 %v792_v11  ;;  %v1240_v13 = vpop.eup %1239  ;;  %v804_v31 = vand.u32 2147483648, %v792_v11  ;;  %v802_v34 = vand.u32 2147483647, %v792_v11  ;;  %vm798_vm9 = vweird.f32 %v792_v11 }
 0x42a   :  { %v814_v14 = vmul.f32 %v1240_v13, %v812_v8  ;;  %vm819_vm12 = vweird.f32 %v1240_v13 }
 0x42b   :  { %v805_v41 = vor.u32 1.1754944e-38, %v804_v31  ;;  %vm803_vm11 = vcmp.eq.f32.partialorder %v802_v34, 8.507059e+37  ;;  %vm820_vm14 = vmor %vm818_vm13, %vm819_vm12 }
 0x42c   :  { %v815_v23 = vsub.f32 1.0, %v814_v14 }
 0x42e   :  { %v816_v28 = vmul.f32 %v1240_v13, %v815_v23 }
 0x42f   :  { %v1242_v16 = vpop.eup %1241 }
 0x430   :  { %v794_v17 = vmul.f32 %v1242_v16, %v792_v11  ;;  %vm799_vm8 = vweird.f32 %v1242_v16  ;;  %v817_v49 = vadd.f32 %v1240_v13, %v816_v28  ;;  %v1167_v11 = vld [vmem:[%s2389_s0 + $0xa0] sm:$0xff] }
 0x431   :  { %vm800_vm10 = vmor %vm798_vm9, %vm799_vm8 }
 0x432   :  { %v795_v26 = vsub.f32 1.0, %v794_v17  ;;  %v821_v57 = vsel %vm820_vm14, %v1240_v13, %v817_v49  ;;  %v980_v49 = vpop.permute.xlu1 %979 }
 0x433   :  { %v826_v63 = vsel %vm823_vm15, %v825_v45, %v821_v57  ;;  %v1173_v45 = vld [vmem:[%s2389_s0 + $0xb0] sm:$0xff] }
 0x434   :  { %v796_v27 = vmul.f32 %v1242_v16, %v795_v26  ;;  %v832_v48 = vsub.f32 1.0, %v826_v63  ;;  %v834_v53 = vmul.f32 %v826_v63, %v2316_v25 }
 0x436   :  { %v797_v29 = vadd.f32 %v1242_v16, %v796_v27 }
 0x438   :  { %v801_v33 = vsel %vm800_vm10, %v1242_v16, %v797_v29 }
 0x439   :  { %v806_v52 = vsel %vm803_vm11, %v805_v41, %v801_v33  ;;  %v971_v33 = vpop.permute.xlu0 %970 }
 0x43a   :  { %v829_v43 = vmul.f32 %v828_v44, %v806_v52 }
 0x43c   :  { %v830_v6 = vadd.f32 %v1160_v35, %v829_v43  ;;  %v1172_v43 = vld [vmem:[%s2389_s0 + $0xa8] sm:$0xff] }
 0x43e   :  { %1243 = vtanh.f32 %v830_v6 }
 0x444   :  { %v1244_v51 = vpop.eup %1243 }
 0x445   :  { %v833_v40 = vmul.f32 %v1244_v51, %v832_v48 }
 0x447   :  { %v835_v59 = vadd.f32 %v834_v53, %v833_v40 }
 0x449   :  { %v843_v1 = vmul.f32 %v841_v60, %v835_v59 }
 0x44b   :  { %1164 = vst [vmem:[%s2390_s4 + $0x28] sm:$0xff] %v843_v1  ;;  %v853_v3 = vadd.f32 %v852_v2, %v843_v1 }
 0x44d   :  { %874 = vmatmul.f32.vlgmr.msra.gmra.mxu2 %v853_v3  ;;  %894 = vmatmul.f32.vlgmr.msra.gmra.mxu3 %v853_v3  ;;  %v982_v52 = vmul.f32 %v980_v49, %v853_v3 }
 0x44e   :  { %914 = vmatmul.f32.vlgmr.msrb.gmra.mxu0 %v853_v3 }
 0x4cb   :  { %v915_v22 = vpop.f32.mrf.mxu0 }
 0x4cc   :  { %v958_v8 = vadd.f32 %v2346_v32, %v915_v22 }
 0x4d0   :  { %v875_v5 = vpop.f32.mrf.mxu2  ;;  %v895_v7 = vpop.f32.mrf.mxu3 }
 0x4d1   :  { %v918_v39 = vadd.f32 %v1165_v47, %v875_v5  ;;  %v938_v42 = vadd.f32 %v1166_v4, %v895_v7 }
 0x4d3   :  { %v1168_v61 = vmul.f32 -1.442695, %v918_v39  ;;  %v1169_v50 = vmul.f32 -1.442695, %v938_v42 }
 0x4d5   :  { %1245 = vpow2.f32 %v1168_v61 }
 0x4d6   :  { %1247 = vpow2.f32 %v1169_v50 }
 0x4db   :  { %v1246_v55 = vpop.eup %1245 }
 0x4dc   :  { %v1248_v21 = vpop.eup %1247  ;;  %v922_v54 = vadd.f32 1.0, %v1246_v55 }
 0x4dd   :  { %v942_v58 = vadd.f32 1.0, %v1248_v21 }
 0x4de   :  { %1249 = vrcp.f32 %v922_v54  ;;  %v934_v9 = vand.u32 2147483648, %v922_v54  ;;  %v932_v18 = vand.u32 2147483647, %v922_v54  ;;  %vm928_vm1 = vweird.f32 %v922_v54 }
 0x4df   :  { %1251 = vrcp.f32 %v942_v58  ;;  %v954_v17 = vand.u32 2147483648, %v942_v58  ;;  %vm948_vm5 = vweird.f32 %v942_v58  ;;  %v952_v23 = vand.u32 2147483647, %v942_v58 }
 0x4e0   :  { %v935_v30 = vor.u32 1.1754944e-38, %v934_v9  ;;  %vm933_vm3 = vcmp.eq.f32.partialorder %v932_v18, 8.507059e+37 }
 0x4e1   :  { %v955_v27 = vor.u32 1.1754944e-38, %v954_v17  ;;  %vm953_vm7 = vcmp.eq.f32.partialorder %v952_v23, 8.507059e+37 }
 0x4e4   :  { %v1250_v19 = vpop.eup %1249 }
 0x4e5   :  { %v1252_v20 = vpop.eup %1251  ;;  %v924_v24 = vmul.f32 %v1250_v19, %v922_v54  ;;  %vm929_vm0 = vweird.f32 %v1250_v19  ;;  %v1174_v54 = vld [vmem:[%s2389_s0 + $0xb8] sm:$0xff] }
 0x4e6   :  { %v944_v25 = vmul.f32 %v1252_v20, %v942_v58  ;;  %vm930_vm2 = vmor %vm928_vm1, %vm929_vm0  ;;  %vm949_vm4 = vweird.f32 %v1252_v20 }
 0x4e7   :  { %v925_v0 = vsub.f32 1.0, %v924_v24  ;;  %vm950_vm6 = vmor %vm948_vm5, %vm949_vm4 }
 0x4e8   :  { %v945_v12 = vsub.f32 1.0, %v944_v25 }
 0x4e9   :  { %v926_v15 = vmul.f32 %v1250_v19, %v925_v0 }
 0x4ea   :  { %v946_v56 = vmul.f32 %v1252_v20, %v945_v12 }
 0x4eb   :  { %v927_v46 = vadd.f32 %v1250_v19, %v926_v15 }
 0x4ec   :  { %v947_v14 = vadd.f32 %v1252_v20, %v946_v56 }
 0x4ed   :  { %v931_v10 = vsel %vm930_vm2, %v1250_v19, %v927_v46 }
 0x4ee   :  { %v936_v13 = vsel %vm933_vm3, %v935_v30, %v931_v10  ;;  %v951_v31 = vsel %vm950_vm6, %v1252_v20, %v947_v14  ;;  %v1101_v10 = vpop.permute.xlu2 %1100 }
 0x4ef   :  { %v959_v16 = vmul.f32 %v958_v8, %v936_v13  ;;  %v956_v34 = vsel %vm953_vm7, %v955_v27, %v951_v31  ;;  %v1110_v8 = vpop.permute.xlu0 %1109 }
 0x4f0   :  { %v962_v28 = vsub.f32 1.0, %v956_v34  ;;  %v964_v41 = vmul.f32 %v956_v34, %v853_v3 }
 0x4f1   :  { %v960_v26 = vadd.f32 %v1167_v11, %v959_v16 }
 0x4f3   :  { %1253 = vtanh.f32 %v960_v26 }
 0x4f9   :  { %v1254_v38 = vpop.eup %1253 }
 0x4fa   :  { %v963_v29 = vmul.f32 %v1254_v38, %v962_v28 }
 0x4fc   :  { %v965_v44 = vadd.f32 %v964_v41, %v963_v29 }
 0x4fe   :  { %v973_v35 = vmul.f32 %v971_v33, %v965_v44 }
 0x500   :  { %1171 = vst [vmem:[%s2390_s4 + $0x30] sm:$0xff] %v973_v35  ;;  %v983_v36 = vadd.f32 %v982_v52, %v973_v35 }
 0x502   :  { %1004 = vmatmul.f32.vlgmr.msrb.gmra.mxu1 %v983_v36  ;;  %1024 = vmatmul.f32.vlgmr.msrb.gmra.mxu2 %v983_v36  ;;  %v1112_v13 = vmul.f32 %v1110_v8, %v983_v36 }
 0x503   :  { %1044 = vmatmul.f32.vlgmr.msrb.gmra.mxu3 %v983_v36 }
 0x57f   :  { %v1005_v37 = vpop.f32.mrf.mxu1 }
 0x580   :  { %v1048_v6 = vadd.f32 %v1172_v43, %v1005_v37 }
 0x582   :  { %v1175_v57 = vmul.f32 -1.442695, %v1048_v6 }
 0x584   :  { %1255 = vpow2.f32 %v1175_v57 }
 0x585   :  { %v1025_v63 = vpop.f32.mrf.mxu2 }
 0x586   :  { %v1068_v48 = vadd.f32 %v1173_v45, %v1025_v63  ;;  %v1045_v7 = vpop.f32.mrf.mxu3 }
 0x587   :  { %v1088_v21 = vadd.f32 %v2346_v32, %v1045_v7 }
 0x588   :  { %v1176_v51 = vmul.f32 -1.442695, %v1068_v48 }
 0x58a   :  { %v1256_v40 = vpop.eup %1255  ;;  %1257 = vpow2.f32 %v1176_v51 }
 0x58b   :  { %v1052_v53 = vadd.f32 1.0, %v1256_v40 }
 0x58d   :  { %1259 = vrcp.f32 %v1052_v53  ;;  %v1064_v3 = vand.u32 2147483648, %v1052_v53  ;;  %v1062_v4 = vand.u32 2147483647, %v1052_v53  ;;  %vm1058_vm9 = vweird.f32 %v1052_v53 }
 0x58f   :  { %v1065_v61 = vor.u32 1.1754944e-38, %v1064_v3  ;;  %vm1063_vm11 = vcmp.eq.f32.partialorder %v1062_v4, 8.507059e+37 }
 0x590   :  { %v1258_v59 = vpop.eup %1257 }
 0x591   :  { %v1072_v60 = vadd.f32 1.0, %v1258_v59 }
 0x593   :  { %v1260_v62 = vpop.eup %1259  ;;  %1261 = vrcp.f32 %v1072_v60  ;;  %v1084_v20 = vand.u32 2147483648, %v1072_v60  ;;  %v1082_v25 = vand.u32 2147483647, %v1072_v60  ;;  %vm1078_vm13 = vweird.f32 %v1072_v60 }
 0x594   :  { %v1054_v1 = vmul.f32 %v1260_v62, %v1052_v53  ;;  %vm1059_vm8 = vweird.f32 %v1260_v62 }
 0x595   :  { %vm1060_vm10 = vmor %vm1058_vm9, %vm1059_vm8  ;;  %v1085_v12 = vor.u32 1.1754944e-38, %v1084_v20  ;;  %vm1083_vm15 = vcmp.eq.f32.partialorder %v1082_v25, 8.507059e+37 }
 0x596   :  { %v1055_v2 = vsub.f32 1.0, %v1054_v1 }
 0x598   :  { %v1056_v47 = vmul.f32 %v1260_v62, %v1055_v2 }
 0x599   :  { %v1262_v5 = vpop.eup %1261 }
 0x59a   :  { %v1074_v39 = vmul.f32 %v1262_v5, %v1072_v60  ;;  %v1057_v42 = vadd.f32 %v1260_v62, %v1056_v47  ;;  %vm1079_vm12 = vweird.f32 %v1262_v5 }
 0x59b   :  { %vm1080_vm14 = vmor %vm1078_vm13, %vm1079_vm12 }
 0x59c   :  { %v1075_v50 = vsub.f32 1.0, %v1074_v39  ;;  %v1061_v55 = vsel %vm1060_vm10, %v1260_v62, %v1057_v42 }
 0x59d   :  { %v1066_v58 = vsel %vm1063_vm11, %v1065_v61, %v1061_v55 }
 0x59e   :  { %v1076_v19 = vmul.f32 %v1262_v5, %v1075_v50  ;;  %v1089_v24 = vmul.f32 %v1088_v21, %v1066_v58 }
 0x5a0   :  { %v1077_v0 = vadd.f32 %v1262_v5, %v1076_v19  ;;  %v1090_v9 = vadd.f32 %v1174_v54, %v1089_v24 }
 0x5a2   :  { %v1081_v15 = vsel %vm1080_vm14, %v1262_v5, %v1077_v0  ;;  %1263 = vtanh.f32 %v1090_v9 }
 0x5a3   :  { %v1086_v18 = vsel %vm1083_vm15, %v1085_v12, %v1081_v15 }
 0x5a4   :  { %v1092_v32 = vsub.f32 1.0, %v1086_v18  ;;  %v1094_v46 = vmul.f32 %v1086_v18, %v983_v36 }
 0x5a8   :  { %v1264_v22 = vpop.eup %1263 }
 0x5a9   :  { %v1093_v56 = vmul.f32 %v1264_v22, %v1092_v32 }
 0x5ab   :  { %v1095_v30 = vadd.f32 %v1094_v46, %v1093_v56 }
 0x5ad   :  { %v1103_v11 = vmul.f32 %v1101_v10, %v1095_v30 }
 0x5af   :  { %1178 = vst [vmem:[%s2390_s4 + $0x38] sm:$0xff] %v1103_v11  ;;  %v1113_v14 = vadd.f32 %v1112_v13, %v1103_v11 }
 0x5b1   :  { %1119 = vst [vmem:[%s2391_s5] sm:$0xff] %v1113_v14 }

</bundles_post_ra>
